<compile_context>
chip_gen: v6e
topology: v6e:2x2x1
jax: 0.10.0
libtpu: 0.0.40
codegen_flags: <defaults>
</compile_context>

<pallas_src>
import functools

import jax
import jax.numpy as jnp
from jax.experimental import pallas as pl
from jax.experimental.pallas import tpu as pltpu

# BlendParams (pytorch3d-style), deterministic constants
SIGMA = 1e-2
GAMMA = 1e-1
ZNEAR = 1.0
ZFAR = 100.0
EPS = 1e-10

_CH = 16        # inner chunk height (sublanes) == bf16 packed-tile height
_BIG = 1e9      # dists value for masked-out faces: sigmoid(-BIG/sigma) == 0


def _round_up(x, m):
    return ((x + m - 1) // m) * m


def _interp_blend_kernel(*refs, K, D, n_chunks):
    """Fused interpolate_face_attributes + softmax_feature_blend.

    Pixel-last (lane-dense) block shapes, TR = tile_rows:
      frag_ref  (2K, TR, 128)     f32  rows: [masked dists(K); masked zbuf(K)]
      bary_ref  (3K, TR, 128)     bf16 rows: k*3 + v                (if D > 0)
      attrs_ref (3*D*K, TR, 128)  bf16 rows: (v*D + d)*K + k        (if D > 0)
      out_ref   (D+1, TR, 128)    f32  rows 0..D-1 features, row D blended mask
    """
    if D > 0:
        frag_ref, bary_ref, attrs_ref, out_ref = refs
    else:
        frag_ref, out_ref = refs
        bary_ref = attrs_ref = None

    inv_sig = -0.5 / (SIGMA + 1e-8)          # sigmoid(x) = 0.5*(tanh(x/2)+1)
    inv_span = 1.0 / (ZFAR - ZNEAR)
    inv_gamma = 1.0 / GAMMA

    def chunk(r0):
        rows = pl.ds(r0, _CH)

        # 2D-distance probability & relative inverse depth per top-K face.
        # The pix_to_face>=0 mask is already folded into dists/zbuf host-side.
        prob = []
        z_inv = []
        for k in range(K):
            d_ = frag_ref[k, rows, :]
            zb = frag_ref[K + k, rows, :]
            prob.append(0.5 * (jnp.tanh(d_ * inv_sig) + 1.0))
            z_inv.append((ZFAR - zb) * inv_span)

        z_max = z_inv[0]
        for k in range(1, K):
            z_max = jnp.maximum(z_max, z_inv[k])
        z_max = jnp.maximum(z_max, EPS)

        w = [prob[k] * jnp.exp((z_inv[k] - z_max) * inv_gamma)
             for k in range(K)]
        delta = jnp.maximum(jnp.exp((EPS - z_max) * inv_gamma), EPS)
        denom = delta
        for k in range(K):
            denom = denom + w[k]
        inv_denom = 1.0 / denom              # exact (parity with reference)

        # Blended (pix_to_face >= 0) feature == (sum_k w_k) / denom.
        out_ref[D, rows, :] = (denom - delta) * inv_denom

        if D > 0:
            # Hoisted: w_k * bary_{k,v} computed once, reused for every d.
            wb = [w[k] * bary_ref[k * 3 + v, rows, :].astype(jnp.float32)
                  for k in range(K) for v in range(3)]
            for d in range(D):
                acc = None
                for k in range(K):
                    for v in range(3):
                        a = attrs_ref[(v * D + d) * K + k, rows, :]
                        t = wb[k * 3 + v] * a.astype(jnp.float32)
                        acc = t if acc is None else acc + t
                # Background is zeros (module default) -> bg term dropped.
                out_ref[d, rows, :] = acc * inv_denom

    if n_chunks == 1:
        chunk(0)
    else:
        @pl.loop(0, n_chunks)
        def _(c):
            chunk(pl.multiple_of(c * _CH, _CH))


def softmax_interp_blend(p2f, dists, zbuf, bary, face_attrs, *, tp_rows=64):
    """Fused interpolate_face_attributes + softmax_feature_blend (lane-dense).

    Args (flat pixel axis P first):
      p2f   (P, K) int32   pix_to_face (-1 == no face)
      dists (P, K) f32     2D distances
      zbuf  (P, K) f32     depths
      bary  (P, K, 3) f32  barycentric coordinates
      face_attrs (F, 3, D) f32 per-face-vertex features, or None
    Returns:
      (D+1, P) f32: rows 0..D-1 blended features, row D blended mask.
    """
    P, K = p2f.shape
    D = 0 if face_attrs is None else int(face_attrs.shape[-1])

    mask = p2f >= 0
    dists_m = jnp.where(mask, dists, _BIG)      # -> prob exactly 0 when masked
    zbuf_m = jnp.where(mask, zbuf, ZFAR)        # -> z_inv exactly 0 when masked

    rows_needed = -(-P // 128)
    tile_rows = max(_CH, min(tp_rows, _round_up(rows_needed, _CH)))
    tile_rows = _round_up(tile_rows, _CH)
    Ppad = _round_up(P, tile_rows * 128)
    pad = Ppad - P
    R = Ppad // 128
    n_steps = R // tile_rows

    # Merged fragment stream, f32, pixel-last: rows [dists(K); zbuf(K)].
    frag = jnp.stack([dists_m, zbuf_m], axis=0)              # (2, P, K)
    frag = frag.transpose(0, 2, 1).reshape(2 * K, P)
    frag = jnp.pad(frag, ((0, 0), (0, pad))).reshape(2 * K, R, 128)

    inputs = [frag]
    in_specs = [pl.BlockSpec((2 * K, tile_rows, 128), lambda i: (0, i, 0))]

    if D > 0:
        Fn = face_attrs.shape[0]
        # bary: (P,K,3) -> (3K, Ppad) bf16, row = k*3 + v.
        bary_t = bary.transpose(1, 2, 0).reshape(3 * K, P).astype(jnp.bfloat16)
        bary_t = jnp.pad(bary_t, ((0, 0), (0, pad))).reshape(3 * K, R, 128)

        # Face-attribute gather emitted directly in the kernel's lane-dense
        # layout (row = (v*D + d)*K + k) — only the tiny table / index arrays
        # are transposed; the pad is folded into the (cheap) index pad.
        tab = face_attrs.astype(jnp.bfloat16).reshape(Fn, 3 * D).T   # (3D, F)
        idx = jnp.clip(p2f, 0, Fn - 1).astype(jnp.int32).T           # (K, P)
        idx = jnp.pad(idx, ((0, 0), (0, pad)))                       # (K, Ppad)
        attrs_t = jnp.take(tab, idx, axis=1)                         # (3D,K,Ppad)
        attrs_t = attrs_t.reshape(3 * D * K, R, 128)

        inputs += [bary_t, attrs_t]
        in_specs += [
            pl.BlockSpec((3 * K, tile_rows, 128), lambda i: (0, i, 0)),
            pl.BlockSpec((3 * D * K, tile_rows, 128), lambda i: (0, i, 0)),
        ]

    bytes_feat = (3 * K * 2 + 3 * K * D * 2) if D > 0 else 0
    cost = pl.CostEstimate(
        flops=Ppad * (10 * K + 6 * K * D + 2 * D + 8),
        transcendentals=Ppad * (2 * K + 2),
        bytes_accessed=Ppad * (2 * K * 4 + (D + 1) * 4 + bytes_feat))

    kernel = functools.partial(_interp_blend_kernel, K=K, D=D,
                               n_chunks=tile_rows // _CH)
    out = pl.pallas_call(
        kernel,
        out_shape=jax.ShapeDtypeStruct((D + 1, R, 128), jnp.float32),
        grid=(n_steps,),
        in_specs=in_specs,
        out_specs=pl.BlockSpec((D + 1, tile_rows, 128), lambda i: (0, i, 0)),
        compiler_params=pltpu.CompilerParams(
            dimension_semantics=("parallel",)),
        cost_estimate=cost,
    )(*inputs)

    return out.reshape(D + 1, Ppad)[:, :P]


# ------------------------- glue: synthetic rasterizer -----------------------

def synthetic_rasterize(verts, faces, R, T, H, W, K, focal, bary_key):
    """Deterministic stand-in for pytorch3d MeshRasterizer (plain JAX glue).

    Returns Fragments-like tensors:
      pix_to_face (N,H,W,K) int32, dists (N,H,W,K) f32,
      zbuf (N,H,W,K) f32, bary_coords (N,H,W,K,3) f32
    """
    N, V, _ = verts.shape
    Fn = faces.shape[0]
    v_cam = jnp.einsum('nvj,nij->nvi', verts, R) + T[:, None, :]    # (N,V,3)
    fverts = v_cam[:, faces, :]                                      # (N,F,3,3)
    cent = fverts.mean(axis=2)                                       # (N,F,3)
    zc = cent[..., 2]
    cx, cy = (W - 1) / 2.0, (H - 1) / 2.0
    px = focal * cent[..., 0] / zc + cx                              # (N,F)
    py = focal * cent[..., 1] / zc + cy
    ys, xs = jnp.meshgrid(jnp.arange(H, dtype=jnp.float32),
                          jnp.arange(W, dtype=jnp.float32), indexing='ij')
    dx = xs[None, :, :, None] - px[:, None, None, :]                 # (N,H,W,F)
    dy = ys[None, :, :, None] - py[:, None, None, :]
    dist2 = (dx * dx + dy * dy) * (2.0 / H) ** 2                     # ~NDC^2
    vals, idx = jax.lax.top_k(-dist2, K)                             # (N,H,W,K)
    dist_k = -vals
    thresh = 0.5
    pix_to_face = jnp.where(dist_k < thresh, idx, -1).astype(jnp.int32)
    dists = dist_k - 0.05                                            # signed-ish
    z_all = jnp.broadcast_to(zc[:, None, None, :], (N, H, W, Fn))
    zbuf = jnp.take_along_axis(z_all, idx, axis=-1)
    zbuf = jnp.where(pix_to_face >= 0, zbuf, -1.0)
    r = jax.random.uniform(bary_key, (N, H, W, K, 3),
                           minval=0.1, maxval=1.0, dtype=jnp.float32)
    bary = r / r.sum(-1, keepdims=True)
    return pix_to_face, dists.astype(jnp.float32), zbuf.astype(jnp.float32), bary


class NeuralRendererPallas:
    """JAX/Pallas port of mmhuman3d NeuralRenderer.forward (no learnable params)."""

    def __init__(self, image_size=16, K=4, focal=10.0, tp_rows=64):
        self.H = self.W = image_size
        self.K = K
        self.focal = focal
        self.tp_rows = tp_rows

    def forward(self, verts, faces, vert_part=None, bary_key=None):
        if bary_key is None:
            bary_key = jax.random.PRNGKey(0)
        N, V, _ = verts.shape
        Fn = faces.shape[0]
        H, W, K = self.H, self.W, self.K
        Rm = jnp.broadcast_to(jnp.eye(3, dtype=jnp.float32), (N, 3, 3))
        Tm = jnp.zeros((N, 3), jnp.float32)

        p2f, dists, zbuf, bary = synthetic_rasterize(
            verts, faces, Rm, Tm, H, W, K, self.focal, bary_key)

        P = N * H * W
        p2f_f = p2f.reshape(P, K)
        dists_f = dists.reshape(P, K)
        zbuf_f = zbuf.reshape(P, K)
        bary_f = bary.reshape(P, K, 3)

        if vert_part is not None:
            Dp = vert_part.shape[-1]
            # Matches the reference indexing: vert_part[faces % vert_part.shape[0]]
            faces_part = vert_part[faces % vert_part.shape[0]].astype(jnp.float32)
        else:
            Dp = 0
            faces_part = None

        blended = softmax_interp_blend(
            p2f_f, dists_f, zbuf_f, bary_f, faces_part,
            tp_rows=self.tp_rows)                                    # (Dp+1, P)

        ret = {}

        # ---- mask: blended (pix_to_face != -1) feature, NCHW ----
        ret['mask'] = blended[Dp].reshape(N, H, W)[:, None, :, :]    # (N,1,H,W)

        # ---- vert_visibility (glue: JAX scatters) ----
        p2f_all = p2f_f.reshape(-1)
        face_vis = jnp.zeros((Fn,), jnp.float32).at[
            jnp.clip(p2f_all, 0, Fn - 1)].max(
                (p2f_all >= 0).astype(jnp.float32))
        vert_vis = jnp.zeros((V,), jnp.float32).at[
            faces.reshape(-1)].max(jnp.repeat(face_vis, 3))
        ret['vert_visibility'] = vert_vis                            # (V,)

        # ---- pixel_part, NCHW ----
        if vert_part is not None:
            ret['pixel_part'] = blended[:Dp].reshape(
                Dp, N, H, W).transpose(1, 0, 2, 3)                   # (N,Dp,H,W)

        # vert_orient_weights is None -> reference default ones (N,1,56,56)
        ret['pixel_orient_weights'] = jnp.ones((N, 1, 56, 56), jnp.float32)
        return ret


if __name__ == "__main__":
    key = jax.random.PRNGKey(0)
    k_v, k_f, k_p, k_b = jax.random.split(key, 4)

    N, V, Fn = 2, 24, 32
    H = W = 64          # P = 8192 -> grid of 2 tiles, 2 inner chunks per tile
    K = 4
    Dpart = 5

    xy = jax.random.uniform(k_v, (N, V, 2), minval=-1.0, maxval=1.0,
                            dtype=jnp.float32)
    z = jax.random.uniform(k_v, (N, V, 1), minval=2.0, maxval=6.0,
                           dtype=jnp.float32)
    verts = jnp.concatenate([xy, z], axis=-1)                        # (N,V,3)
    faces = jax.random.randint(k_f, (Fn, 3), 0, V, dtype=jnp.int32)  # (F,3)
    vert_part = jax.random.uniform(k_p, (V, Dpart), dtype=jnp.float32)

    renderer = NeuralRendererPallas(image_size=H, K=K, tp_rows=32)
    out = renderer.forward(verts, faces, vert_part=vert_part, bary_key=k_b)

    out = jax.block_until_ready(out)
    assert out['mask'].shape == (N, 1, H, W)
    assert out['pixel_part'].shape == (N, Dpart, H, W)
    assert out['vert_visibility'].shape == (V,)
    assert out['pixel_orient_weights'].shape == (N, 1, 56, 56)
    assert not bool(jnp.isnan(out['mask']).any())
    assert not bool(jnp.isnan(out['pixel_part']).any())
    print("KERNEL_OK")
</pallas_src>

<mosaic_0001>
module attributes {stable_mosaic.version = 11 : i64} {
  func.func @_interp_blend_kernel(%arg0: i32, %arg1: memref<8x32x128xf32, #tpu.memory_space<vmem>>, %arg2: memref<12x32x128xbf16, #tpu.memory_space<vmem>>, %arg3: memref<60x32x128xbf16, #tpu.memory_space<vmem>>, %arg4: memref<6x32x128xf32, #tpu.memory_space<vmem>>) attributes {dimension_semantics = [#tpu.dimension_semantics<parallel>], iteration_bounds = array<i64: 2>, scalar_prefetch = 0 : i64, scratch_operands = 0 : i64, tpu.core_type = #tpu.core_type<tc>, window_params = [{transform_indices = @transform_0, window_bounds = array<i64: 8, 32, 128>}, {transform_indices = @transform_1, window_bounds = array<i64: 12, 32, 128>}, {transform_indices = @transform_2, window_bounds = array<i64: 60, 32, 128>}, {transform_indices = @transform_3, window_bounds = array<i64: 6, 32, 128>}]} {
    %c0_i32 = arith.constant 0 : i32
    %c2_i32 = arith.constant 2 : i32
    %0 = arith.addi %c0_i32, %c2_i32 : i32
    %c1_i32 = arith.constant 1 : i32
    scf.for %arg5 = %c0_i32 to %0 step %c1_i32  : i32 {
      %c1_i32_1 = arith.constant 1 : i32
      %1 = arith.muli %arg5, %c1_i32_1 : i32
      %c0_i32_2 = arith.constant 0 : i32
      %2 = arith.addi %c0_i32_2, %1 : i32
      %c16_i32 = arith.constant 16 : i32
      %3 = arith.muli %2, %c16_i32 : i32
      %4 = tpu.assume_multiple %3, 16 : i32
      %c0 = arith.constant 0 : index
      %5 = arith.index_cast %4 : i32 to index
      %c0_3 = arith.constant 0 : index
      %6 = vector.load %arg1[%c0, %5, %c0_3] : memref<8x32x128xf32, #tpu.memory_space<vmem>>, vector<1x16x128xf32>
      %7 = vector.shape_cast %6 : vector<1x16x128xf32> to vector<16x128xf32>
      %c4 = arith.constant 4 : index
      %8 = arith.index_cast %4 : i32 to index
      %c0_4 = arith.constant 0 : index
      %9 = vector.load %arg1[%c4, %8, %c0_4] : memref<8x32x128xf32, #tpu.memory_space<vmem>>, vector<1x16x128xf32>
      %10 = vector.shape_cast %9 : vector<1x16x128xf32> to vector<16x128xf32>
      %cst = arith.constant -49.9999504 : f32
      %11 = vector.broadcast %cst : f32 to vector<16x128xf32>
      %12 = arith.mulf %7, %11 : vector<16x128xf32>
      %13 = math.tanh %12 : vector<16x128xf32>
      %cst_5 = arith.constant 1.000000e+00 : f32
      %14 = vector.broadcast %cst_5 : f32 to vector<16x128xf32>
      %15 = arith.addf %13, %14 : vector<16x128xf32>
      %cst_6 = arith.constant 5.000000e-01 : f32
      %16 = vector.broadcast %cst_6 : f32 to vector<16x128xf32>
      %17 = arith.mulf %16, %15 : vector<16x128xf32>
      %cst_7 = arith.constant 1.000000e+02 : f32
      %18 = vector.broadcast %cst_7 : f32 to vector<16x128xf32>
      %19 = arith.subf %18, %10 : vector<16x128xf32>
      %cst_8 = arith.constant 0.0101010101 : f32
      %20 = vector.broadcast %cst_8 : f32 to vector<16x128xf32>
      %21 = arith.mulf %19, %20 : vector<16x128xf32>
      %c1 = arith.constant 1 : index
      %22 = arith.index_cast %4 : i32 to index
      %c0_9 = arith.constant 0 : index
      %23 = vector.load %arg1[%c1, %22, %c0_9] : memref<8x32x128xf32, #tpu.memory_space<vmem>>, vector<1x16x128xf32>
      %24 = vector.shape_cast %23 : vector<1x16x128xf32> to vector<16x128xf32>
      %c5 = arith.constant 5 : index
      %25 = arith.index_cast %4 : i32 to index
      %c0_10 = arith.constant 0 : index
      %26 = vector.load %arg1[%c5, %25, %c0_10] : memref<8x32x128xf32, #tpu.memory_space<vmem>>, vector<1x16x128xf32>
      %27 = vector.shape_cast %26 : vector<1x16x128xf32> to vector<16x128xf32>
      %cst_11 = arith.constant -49.9999504 : f32
      %28 = vector.broadcast %cst_11 : f32 to vector<16x128xf32>
      %29 = arith.mulf %24, %28 : vector<16x128xf32>
      %30 = math.tanh %29 : vector<16x128xf32>
      %cst_12 = arith.constant 1.000000e+00 : f32
      %31 = vector.broadcast %cst_12 : f32 to vector<16x128xf32>
      %32 = arith.addf %30, %31 : vector<16x128xf32>
      %cst_13 = arith.constant 5.000000e-01 : f32
      %33 = vector.broadcast %cst_13 : f32 to vector<16x128xf32>
      %34 = arith.mulf %33, %32 : vector<16x128xf32>
      %cst_14 = arith.constant 1.000000e+02 : f32
      %35 = vector.broadcast %cst_14 : f32 to vector<16x128xf32>
      %36 = arith.subf %35, %27 : vector<16x128xf32>
      %cst_15 = arith.constant 0.0101010101 : f32
      %37 = vector.broadcast %cst_15 : f32 to vector<16x128xf32>
      %38 = arith.mulf %36, %37 : vector<16x128xf32>
      %c2 = arith.constant 2 : index
      %39 = arith.index_cast %4 : i32 to index
      %c0_16 = arith.constant 0 : index
      %40 = vector.load %arg1[%c2, %39, %c0_16] : memref<8x32x128xf32, #tpu.memory_space<vmem>>, vector<1x16x128xf32>
      %41 = vector.shape_cast %40 : vector<1x16x128xf32> to vector<16x128xf32>
      %c6 = arith.constant 6 : index
      %42 = arith.index_cast %4 : i32 to index
      %c0_17 = arith.constant 0 : index
      %43 = vector.load %arg1[%c6, %42, %c0_17] : memref<8x32x128xf32, #tpu.memory_space<vmem>>, vector<1x16x128xf32>
      %44 = vector.shape_cast %43 : vector<1x16x128xf32> to vector<16x128xf32>
      %cst_18 = arith.constant -49.9999504 : f32
      %45 = vector.broadcast %cst_18 : f32 to vector<16x128xf32>
      %46 = arith.mulf %41, %45 : vector<16x128xf32>
      %47 = math.tanh %46 : vector<16x128xf32>
      %cst_19 = arith.constant 1.000000e+00 : f32
      %48 = vector.broadcast %cst_19 : f32 to vector<16x128xf32>
      %49 = arith.addf %47, %48 : vector<16x128xf32>
      %cst_20 = arith.constant 5.000000e-01 : f32
      %50 = vector.broadcast %cst_20 : f32 to vector<16x128xf32>
      %51 = arith.mulf %50, %49 : vector<16x128xf32>
      %cst_21 = arith.constant 1.000000e+02 : f32
      %52 = vector.broadcast %cst_21 : f32 to vector<16x128xf32>
      %53 = arith.subf %52, %44 : vector<16x128xf32>
      %cst_22 = arith.constant 0.0101010101 : f32
      %54 = vector.broadcast %cst_22 : f32 to vector<16x128xf32>
      %55 = arith.mulf %53, %54 : vector<16x128xf32>
      %c3 = arith.constant 3 : index
      %56 = arith.index_cast %4 : i32 to index
      %c0_23 = arith.constant 0 : index
      %57 = vector.load %arg1[%c3, %56, %c0_23] : memref<8x32x128xf32, #tpu.memory_space<vmem>>, vector<1x16x128xf32>
      %58 = vector.shape_cast %57 : vector<1x16x128xf32> to vector<16x128xf32>
      %c7 = arith.constant 7 : index
      %59 = arith.index_cast %4 : i32 to index
      %c0_24 = arith.constant 0 : index
      %60 = vector.load %arg1[%c7, %59, %c0_24] : memref<8x32x128xf32, #tpu.memory_space<vmem>>, vector<1x16x128xf32>
      %61 = vector.shape_cast %60 : vector<1x16x128xf32> to vector<16x128xf32>
      %cst_25 = arith.constant -49.9999504 : f32
      %62 = vector.broadcast %cst_25 : f32 to vector<16x128xf32>
      %63 = arith.mulf %58, %62 : vector<16x128xf32>
      %64 = math.tanh %63 : vector<16x128xf32>
      %cst_26 = arith.constant 1.000000e+00 : f32
      %65 = vector.broadcast %cst_26 : f32 to vector<16x128xf32>
      %66 = arith.addf %64, %65 : vector<16x128xf32>
      %cst_27 = arith.constant 5.000000e-01 : f32
      %67 = vector.broadcast %cst_27 : f32 to vector<16x128xf32>
      %68 = arith.mulf %67, %66 : vector<16x128xf32>
      %cst_28 = arith.constant 1.000000e+02 : f32
      %69 = vector.broadcast %cst_28 : f32 to vector<16x128xf32>
      %70 = arith.subf %69, %61 : vector<16x128xf32>
      %cst_29 = arith.constant 0.0101010101 : f32
      %71 = vector.broadcast %cst_29 : f32 to vector<16x128xf32>
      %72 = arith.mulf %70, %71 : vector<16x128xf32>
      %73 = arith.maximumf %21, %38 : vector<16x128xf32>
      %74 = arith.maximumf %73, %55 : vector<16x128xf32>
      %75 = arith.maximumf %74, %72 : vector<16x128xf32>
      %cst_30 = arith.constant 1.000000e-10 : f32
      %76 = vector.broadcast %cst_30 : f32 to vector<16x128xf32>
      %77 = arith.maximumf %75, %76 : vector<16x128xf32>
      %78 = arith.subf %21, %77 : vector<16x128xf32>
      %cst_31 = arith.constant 1.000000e+01 : f32
      %79 = vector.broadcast %cst_31 : f32 to vector<16x128xf32>
      %80 = arith.mulf %78, %79 : vector<16x128xf32>
      %81 = math.exp %80 : vector<16x128xf32>
      %82 = arith.mulf %17, %81 : vector<16x128xf32>
      %83 = arith.subf %38, %77 : vector<16x128xf32>
      %cst_32 = arith.constant 1.000000e+01 : f32
      %84 = vector.broadcast %cst_32 : f32 to vector<16x128xf32>
      %85 = arith.mulf %83, %84 : vector<16x128xf32>
      %86 = math.exp %85 : vector<16x128xf32>
      %87 = arith.mulf %34, %86 : vector<16x128xf32>
      %88 = arith.subf %55, %77 : vector<16x128xf32>
      %cst_33 = arith.constant 1.000000e+01 : f32
      %89 = vector.broadcast %cst_33 : f32 to vector<16x128xf32>
      %90 = arith.mulf %88, %89 : vector<16x128xf32>
      %91 = math.exp %90 : vector<16x128xf32>
      %92 = arith.mulf %51, %91 : vector<16x128xf32>
      %93 = arith.subf %72, %77 : vector<16x128xf32>
      %cst_34 = arith.constant 1.000000e+01 : f32
      %94 = vector.broadcast %cst_34 : f32 to vector<16x128xf32>
      %95 = arith.mulf %93, %94 : vector<16x128xf32>
      %96 = math.exp %95 : vector<16x128xf32>
      %97 = arith.mulf %68, %96 : vector<16x128xf32>
      %cst_35 = arith.constant 1.000000e-10 : f32
      %98 = vector.broadcast %cst_35 : f32 to vector<16x128xf32>
      %99 = arith.subf %98, %77 : vector<16x128xf32>
      %cst_36 = arith.constant 1.000000e+01 : f32
      %100 = vector.broadcast %cst_36 : f32 to vector<16x128xf32>
      %101 = arith.mulf %99, %100 : vector<16x128xf32>
      %102 = math.exp %101 : vector<16x128xf32>
      %cst_37 = arith.constant 1.000000e-10 : f32
      %103 = vector.broadcast %cst_37 : f32 to vector<16x128xf32>
      %104 = arith.maximumf %102, %103 : vector<16x128xf32>
      %105 = arith.addf %104, %82 : vector<16x128xf32>
      %106 = arith.addf %105, %87 : vector<16x128xf32>
      %107 = arith.addf %106, %92 : vector<16x128xf32>
      %108 = arith.addf %107, %97 : vector<16x128xf32>
      %cst_38 = arith.constant 1.000000e+00 : f32
      %109 = vector.broadcast %cst_38 : f32 to vector<16x128xf32>
      %110 = arith.divf %109, %108 : vector<16x128xf32>
      %111 = arith.subf %108, %104 : vector<16x128xf32>
      %112 = arith.mulf %111, %110 : vector<16x128xf32>
      %c5_39 = arith.constant 5 : index
      %113 = arith.index_cast %4 : i32 to index
      %c0_40 = arith.constant 0 : index
      %114 = vector.load %arg4[%c5_39, %113, %c0_40] : memref<6x32x128xf32, #tpu.memory_space<vmem>>, vector<1x16x128xf32>
      %115 = vector.shape_cast %114 : vector<1x16x128xf32> to vector<16x128xf32>
      %116 = vector.shape_cast %112 : vector<16x128xf32> to vector<1x16x128xf32>
      tpu.vector_store %arg4[%c5_39, %113, %c0_40], %116 {strides = array<i32>} : memref<6x32x128xf32, #tpu.memory_space<vmem>>, vector<1x16x128xf32>,
      %c0_41 = arith.constant 0 : index
      %117 = arith.index_cast %4 : i32 to index
      %c0_42 = arith.constant 0 : index
      %118 = vector.load %arg2[%c0_41, %117, %c0_42] : memref<12x32x128xbf16, #tpu.memory_space<vmem>>, vector<1x16x128xbf16>
      %119 = vector.shape_cast %118 : vector<1x16x128xbf16> to vector<16x128xbf16>
      %120 = arith.extf %119 : vector<16x128xbf16> to vector<16x128xf32>
      %121 = arith.mulf %82, %120 : vector<16x128xf32>
      %c1_43 = arith.constant 1 : index
      %122 = arith.index_cast %4 : i32 to index
      %c0_44 = arith.constant 0 : index
      %123 = vector.load %arg2[%c1_43, %122, %c0_44] : memref<12x32x128xbf16, #tpu.memory_space<vmem>>, vector<1x16x128xbf16>
      %124 = vector.shape_cast %123 : vector<1x16x128xbf16> to vector<16x128xbf16>
      %125 = arith.extf %124 : vector<16x128xbf16> to vector<16x128xf32>
      %126 = arith.mulf %82, %125 : vector<16x128xf32>
      %c2_45 = arith.constant 2 : index
      %127 = arith.index_cast %4 : i32 to index
      %c0_46 = arith.constant 0 : index
      %128 = vector.load %arg2[%c2_45, %127, %c0_46] : memref<12x32x128xbf16, #tpu.memory_space<vmem>>, vector<1x16x128xbf16>
      %129 = vector.shape_cast %128 : vector<1x16x128xbf16> to vector<16x128xbf16>
      %130 = arith.extf %129 : vector<16x128xbf16> to vector<16x128xf32>
      %131 = arith.mulf %82, %130 : vector<16x128xf32>
      %c3_47 = arith.constant 3 : index
      %132 = arith.index_cast %4 : i32 to index
      %c0_48 = arith.constant 0 : index
      %133 = vector.load %arg2[%c3_47, %132, %c0_48] : memref<12x32x128xbf16, #tpu.memory_space<vmem>>, vector<1x16x128xbf16>
      %134 = vector.shape_cast %133 : vector<1x16x128xbf16> to vector<16x128xbf16>
      %135 = arith.extf %134 : vector<16x128xbf16> to vector<16x128xf32>
      %136 = arith.mulf %87, %135 : vector<16x128xf32>
      %c4_49 = arith.constant 4 : index
      %137 = arith.index_cast %4 : i32 to index
      %c0_50 = arith.constant 0 : index
      %138 = vector.load %arg2[%c4_49, %137, %c0_50] : memref<12x32x128xbf16, #tpu.memory_space<vmem>>, vector<1x16x128xbf16>
      %139 = vector.shape_cast %138 : vector<1x16x128xbf16> to vector<16x128xbf16>
      %140 = arith.extf %139 : vector<16x128xbf16> to vector<16x128xf32>
      %141 = arith.mulf %87, %140 : vector<16x128xf32>
      %c5_51 = arith.constant 5 : index
      %142 = arith.index_cast %4 : i32 to index
      %c0_52 = arith.constant 0 : index
      %143 = vector.load %arg2[%c5_51, %142, %c0_52] : memref<12x32x128xbf16, #tpu.memory_space<vmem>>, vector<1x16x128xbf16>
      %144 = vector.shape_cast %143 : vector<1x16x128xbf16> to vector<16x128xbf16>
      %145 = arith.extf %144 : vector<16x128xbf16> to vector<16x128xf32>
      %146 = arith.mulf %87, %145 : vector<16x128xf32>
      %c6_53 = arith.constant 6 : index
      %147 = arith.index_cast %4 : i32 to index
      %c0_54 = arith.constant 0 : index
      %148 = vector.load %arg2[%c6_53, %147, %c0_54] : memref<12x32x128xbf16, #tpu.memory_space<vmem>>, vector<1x16x128xbf16>
      %149 = vector.shape_cast %148 : vector<1x16x128xbf16> to vector<16x128xbf16>
      %150 = arith.extf %149 : vector<16x128xbf16> to vector<16x128xf32>
      %151 = arith.mulf %92, %150 : vector<16x128xf32>
      %c7_55 = arith.constant 7 : index
      %152 = arith.index_cast %4 : i32 to index
      %c0_56 = arith.constant 0 : index
      %153 = vector.load %arg2[%c7_55, %152, %c0_56] : memref<12x32x128xbf16, #tpu.memory_space<vmem>>, vector<1x16x128xbf16>
      %154 = vector.shape_cast %153 : vector<1x16x128xbf16> to vector<16x128xbf16>
      %155 = arith.extf %154 : vector<16x128xbf16> to vector<16x128xf32>
      %156 = arith.mulf %92, %155 : vector<16x128xf32>
      %c8 = arith.constant 8 : index
      %157 = arith.index_cast %4 : i32 to index
      %c0_57 = arith.constant 0 : index
      %158 = vector.load %arg2[%c8, %157, %c0_57] : memref<12x32x128xbf16, #tpu.memory_space<vmem>>, vector<1x16x128xbf16>
      %159 = vector.shape_cast %158 : vector<1x16x128xbf16> to vector<16x128xbf16>
      %160 = arith.extf %159 : vector<16x128xbf16> to vector<16x128xf32>
      %161 = arith.mulf %92, %160 : vector<16x128xf32>
      %c9 = arith.constant 9 : index
      %162 = arith.index_cast %4 : i32 to index
      %c0_58 = arith.constant 0 : index
      %163 = vector.load %arg2[%c9, %162, %c0_58] : memref<12x32x128xbf16, #tpu.memory_space<vmem>>, vector<1x16x128xbf16>
      %164 = vector.shape_cast %163 : vector<1x16x128xbf16> to vector<16x128xbf16>
      %165 = arith.extf %164 : vector<16x128xbf16> to vector<16x128xf32>
      %166 = arith.mulf %97, %165 : vector<16x128xf32>
      %c10 = arith.constant 10 : index
      %167 = arith.index_cast %4 : i32 to index
      %c0_59 = arith.constant 0 : index
      %168 = vector.load %arg2[%c10, %167, %c0_59] : memref<12x32x128xbf16, #tpu.memory_space<vmem>>, vector<1x16x128xbf16>
      %169 = vector.shape_cast %168 : vector<1x16x128xbf16> to vector<16x128xbf16>
      %170 = arith.extf %169 : vector<16x128xbf16> to vector<16x128xf32>
      %171 = arith.mulf %97, %170 : vector<16x128xf32>
      %c11 = arith.constant 11 : index
      %172 = arith.index_cast %4 : i32 to index
      %c0_60 = arith.constant 0 : index
      %173 = vector.load %arg2[%c11, %172, %c0_60] : memref<12x32x128xbf16, #tpu.memory_space<vmem>>, vector<1x16x128xbf16>
      %174 = vector.shape_cast %173 : vector<1x16x128xbf16> to vector<16x128xbf16>
      %175 = arith.extf %174 : vector<16x128xbf16> to vector<16x128xf32>
      %176 = arith.mulf %97, %175 : vector<16x128xf32>
      %c0_61 = arith.constant 0 : index
      %177 = arith.index_cast %4 : i32 to index
      %c0_62 = arith.constant 0 : index
      %178 = vector.load %arg3[%c0_61, %177, %c0_62] : memref<60x32x128xbf16, #tpu.memory_space<vmem>>, vector<1x16x128xbf16>
      %179 = vector.shape_cast %178 : vector<1x16x128xbf16> to vector<16x128xbf16>
      %180 = arith.extf %179 : vector<16x128xbf16> to vector<16x128xf32>
      %181 = arith.mulf %121, %180 : vector<16x128xf32>
      %c20 = arith.constant 20 : index
      %182 = arith.index_cast %4 : i32 to index
      %c0_63 = arith.constant 0 : index
      %183 = vector.load %arg3[%c20, %182, %c0_63] : memref<60x32x128xbf16, #tpu.memory_space<vmem>>, vector<1x16x128xbf16>
      %184 = vector.shape_cast %183 : vector<1x16x128xbf16> to vector<16x128xbf16>
      %185 = arith.extf %184 : vector<16x128xbf16> to vector<16x128xf32>
      %186 = arith.mulf %126, %185 : vector<16x128xf32>
      %187 = arith.addf %181, %186 : vector<16x128xf32>
      %c40 = arith.constant 40 : index
      %188 = arith.index_cast %4 : i32 to index
      %c0_64 = arith.constant 0 : index
      %189 = vector.load %arg3[%c40, %188, %c0_64] : memref<60x32x128xbf16, #tpu.memory_space<vmem>>, vector<1x16x128xbf16>
      %190 = vector.shape_cast %189 : vector<1x16x128xbf16> to vector<16x128xbf16>
      %191 = arith.extf %190 : vector<16x128xbf16> to vector<16x128xf32>
      %192 = arith.mulf %131, %191 : vector<16x128xf32>
      %193 = arith.addf %187, %192 : vector<16x128xf32>
      %c1_65 = arith.constant 1 : index
      %194 = arith.index_cast %4 : i32 to index
      %c0_66 = arith.constant 0 : index
      %195 = vector.load %arg3[%c1_65, %194, %c0_66] : memref<60x32x128xbf16, #tpu.memory_space<vmem>>, vector<1x16x128xbf16>
      %196 = vector.shape_cast %195 : vector<1x16x128xbf16> to vector<16x128xbf16>
      %197 = arith.extf %196 : vector<16x128xbf16> to vector<16x128xf32>
      %198 = arith.mulf %136, %197 : vector<16x128xf32>
      %199 = arith.addf %193, %198 : vector<16x128xf32>
      %c21 = arith.constant 21 : index
      %200 = arith.index_cast %4 : i32 to index
      %c0_67 = arith.constant 0 : index
      %201 = vector.load %arg3[%c21, %200, %c0_67] : memref<60x32x128xbf16, #tpu.memory_space<vmem>>, vector<1x16x128xbf16>
      %202 = vector.shape_cast %201 : vector<1x16x128xbf16> to vector<16x128xbf16>
      %203 = arith.extf %202 : vector<16x128xbf16> to vector<16x128xf32>
      %204 = arith.mulf %141, %203 : vector<16x128xf32>
      %205 = arith.addf %199, %204 : vector<16x128xf32>
      %c41 = arith.constant 41 : index
      %206 = arith.index_cast %4 : i32 to index
      %c0_68 = arith.constant 0 : index
      %207 = vector.load %arg3[%c41, %206, %c0_68] : memref<60x32x128xbf16, #tpu.memory_space<vmem>>, vector<1x16x128xbf16>
      %208 = vector.shape_cast %207 : vector<1x16x128xbf16> to vector<16x128xbf16>
      %209 = arith.extf %208 : vector<16x128xbf16> to vector<16x128xf32>
      %210 = arith.mulf %146, %209 : vector<16x128xf32>
      %211 = arith.addf %205, %210 : vector<16x128xf32>
      %c2_69 = arith.constant 2 : index
      %212 = arith.index_cast %4 : i32 to index
      %c0_70 = arith.constant 0 : index
      %213 = vector.load %arg3[%c2_69, %212, %c0_70] : memref<60x32x128xbf16, #tpu.memory_space<vmem>>, vector<1x16x128xbf16>
      %214 = vector.shape_cast %213 : vector<1x16x128xbf16> to vector<16x128xbf16>
      %215 = arith.extf %214 : vector<16x128xbf16> to vector<16x128xf32>
      %216 = arith.mulf %151, %215 : vector<16x128xf32>
      %217 = arith.addf %211, %216 : vector<16x128xf32>
      %c22 = arith.constant 22 : index
      %218 = arith.index_cast %4 : i32 to index
      %c0_71 = arith.constant 0 : index
      %219 = vector.load %arg3[%c22, %218, %c0_71] : memref<60x32x128xbf16, #tpu.memory_space<vmem>>, vector<1x16x128xbf16>
      %220 = vector.shape_cast %219 : vector<1x16x128xbf16> to vector<16x128xbf16>
      %221 = arith.extf %220 : vector<16x128xbf16> to vector<16x128xf32>
      %222 = arith.mulf %156, %221 : vector<16x128xf32>
      %223 = arith.addf %217, %222 : vector<16x128xf32>
      %c42 = arith.constant 42 : index
      %224 = arith.index_cast %4 : i32 to index
      %c0_72 = arith.constant 0 : index
      %225 = vector.load %arg3[%c42, %224, %c0_72] : memref<60x32x128xbf16, #tpu.memory_space<vmem>>, vector<1x16x128xbf16>
      %226 = vector.shape_cast %225 : vector<1x16x128xbf16> to vector<16x128xbf16>
      %227 = arith.extf %226 : vector<16x128xbf16> to vector<16x128xf32>
      %228 = arith.mulf %161, %227 : vector<16x128xf32>
      %229 = arith.addf %223, %228 : vector<16x128xf32>
      %c3_73 = arith.constant 3 : index
      %230 = arith.index_cast %4 : i32 to index
      %c0_74 = arith.constant 0 : index
      %231 = vector.load %arg3[%c3_73, %230, %c0_74] : memref<60x32x128xbf16, #tpu.memory_space<vmem>>, vector<1x16x128xbf16>
      %232 = vector.shape_cast %231 : vector<1x16x128xbf16> to vector<16x128xbf16>
      %233 = arith.extf %232 : vector<16x128xbf16> to vector<16x128xf32>
      %234 = arith.mulf %166, %233 : vector<16x128xf32>
      %235 = arith.addf %229, %234 : vector<16x128xf32>
      %c23 = arith.constant 23 : index
      %236 = arith.index_cast %4 : i32 to index
      %c0_75 = arith.constant 0 : index
      %237 = vector.load %arg3[%c23, %236, %c0_75] : memref<60x32x128xbf16, #tpu.memory_space<vmem>>, vector<1x16x128xbf16>
      %238 = vector.shape_cast %237 : vector<1x16x128xbf16> to vector<16x128xbf16>
      %239 = arith.extf %238 : vector<16x128xbf16> to vector<16x128xf32>
      %240 = arith.mulf %171, %239 : vector<16x128xf32>
      %241 = arith.addf %235, %240 : vector<16x128xf32>
      %c43 = arith.constant 43 : index
      %242 = arith.index_cast %4 : i32 to index
      %c0_76 = arith.constant 0 : index
      %243 = vector.load %arg3[%c43, %242, %c0_76] : memref<60x32x128xbf16, #tpu.memory_space<vmem>>, vector<1x16x128xbf16>
      %244 = vector.shape_cast %243 : vector<1x16x128xbf16> to vector<16x128xbf16>
      %245 = arith.extf %244 : vector<16x128xbf16> to vector<16x128xf32>
      %246 = arith.mulf %176, %245 : vector<16x128xf32>
      %247 = arith.addf %241, %246 : vector<16x128xf32>
      %248 = arith.mulf %247, %110 : vector<16x128xf32>
      %c0_77 = arith.constant 0 : index
      %249 = arith.index_cast %4 : i32 to index
      %c0_78 = arith.constant 0 : index
      %250 = vector.load %arg4[%c0_77, %249, %c0_78] : memref<6x32x128xf32, #tpu.memory_space<vmem>>, vector<1x16x128xf32>
      %251 = vector.shape_cast %250 : vector<1x16x128xf32> to vector<16x128xf32>
      %252 = vector.shape_cast %248 : vector<16x128xf32> to vector<1x16x128xf32>
      tpu.vector_store %arg4[%c0_77, %249, %c0_78], %252 {strides = array<i32>} : memref<6x32x128xf32, #tpu.memory_space<vmem>>, vector<1x16x128xf32>,
      %c4_79 = arith.constant 4 : index
      %253 = arith.index_cast %4 : i32 to index
      %c0_80 = arith.constant 0 : index
      %254 = vector.load %arg3[%c4_79, %253, %c0_80] : memref<60x32x128xbf16, #tpu.memory_space<vmem>>, vector<1x16x128xbf16>
      %255 = vector.shape_cast %254 : vector<1x16x128xbf16> to vector<16x128xbf16>
      %256 = arith.extf %255 : vector<16x128xbf16> to vector<16x128xf32>
      %257 = arith.mulf %121, %256 : vector<16x128xf32>
      %c24 = arith.constant 24 : index
      %258 = arith.index_cast %4 : i32 to index
      %c0_81 = arith.constant 0 : index
      %259 = vector.load %arg3[%c24, %258, %c0_81] : memref<60x32x128xbf16, #tpu.memory_space<vmem>>, vector<1x16x128xbf16>
      %260 = vector.shape_cast %259 : vector<1x16x128xbf16> to vector<16x128xbf16>
      %261 = arith.extf %260 : vector<16x128xbf16> to vector<16x128xf32>
      %262 = arith.mulf %126, %261 : vector<16x128xf32>
      %263 = arith.addf %257, %262 : vector<16x128xf32>
      %c44 = arith.constant 44 : index
      %264 = arith.index_cast %4 : i32 to index
      %c0_82 = arith.constant 0 : index
      %265 = vector.load %arg3[%c44, %264, %c0_82] : memref<60x32x128xbf16, #tpu.memory_space<vmem>>, vector<1x16x128xbf16>
      %266 = vector.shape_cast %265 : vector<1x16x128xbf16> to vector<16x128xbf16>
      %267 = arith.extf %266 : vector<16x128xbf16> to vector<16x128xf32>
      %268 = arith.mulf %131, %267 : vector<16x128xf32>
      %269 = arith.addf %263, %268 : vector<16x128xf32>
      %c5_83 = arith.constant 5 : index
      %270 = arith.index_cast %4 : i32 to index
      %c0_84 = arith.constant 0 : index
      %271 = vector.load %arg3[%c5_83, %270, %c0_84] : memref<60x32x128xbf16, #tpu.memory_space<vmem>>, vector<1x16x128xbf16>
      %272 = vector.shape_cast %271 : vector<1x16x128xbf16> to vector<16x128xbf16>
      %273 = arith.extf %272 : vector<16x128xbf16> to vector<16x128xf32>
      %274 = arith.mulf %136, %273 : vector<16x128xf32>
      %275 = arith.addf %269, %274 : vector<16x128xf32>
      %c25 = arith.constant 25 : index
      %276 = arith.index_cast %4 : i32 to index
      %c0_85 = arith.constant 0 : index
      %277 = vector.load %arg3[%c25, %276, %c0_85] : memref<60x32x128xbf16, #tpu.memory_space<vmem>>, vector<1x16x128xbf16>
      %278 = vector.shape_cast %277 : vector<1x16x128xbf16> to vector<16x128xbf16>
      %279 = arith.extf %278 : vector<16x128xbf16> to vector<16x128xf32>
      %280 = arith.mulf %141, %279 : vector<16x128xf32>
      %281 = arith.addf %275, %280 : vector<16x128xf32>
      %c45 = arith.constant 45 : index
      %282 = arith.index_cast %4 : i32 to index
      %c0_86 = arith.constant 0 : index
      %283 = vector.load %arg3[%c45, %282, %c0_86] : memref<60x32x128xbf16, #tpu.memory_space<vmem>>, vector<1x16x128xbf16>
      %284 = vector.shape_cast %283 : vector<1x16x128xbf16> to vector<16x128xbf16>
      %285 = arith.extf %284 : vector<16x128xbf16> to vector<16x128xf32>
      %286 = arith.mulf %146, %285 : vector<16x128xf32>
      %287 = arith.addf %281, %286 : vector<16x128xf32>
      %c6_87 = arith.constant 6 : index
      %288 = arith.index_cast %4 : i32 to index
      %c0_88 = arith.constant 0 : index
      %289 = vector.load %arg3[%c6_87, %288, %c0_88] : memref<60x32x128xbf16, #tpu.memory_space<vmem>>, vector<1x16x128xbf16>
      %290 = vector.shape_cast %289 : vector<1x16x128xbf16> to vector<16x128xbf16>
      %291 = arith.extf %290 : vector<16x128xbf16> to vector<16x128xf32>
      %292 = arith.mulf %151, %291 : vector<16x128xf32>
      %293 = arith.addf %287, %292 : vector<16x128xf32>
      %c26 = arith.constant 26 : index
      %294 = arith.index_cast %4 : i32 to index
      %c0_89 = arith.constant 0 : index
      %295 = vector.load %arg3[%c26, %294, %c0_89] : memref<60x32x128xbf16, #tpu.memory_space<vmem>>, vector<1x16x128xbf16>
      %296 = vector.shape_cast %295 : vector<1x16x128xbf16> to vector<16x128xbf16>
      %297 = arith.extf %296 : vector<16x128xbf16> to vector<16x128xf32>
      %298 = arith.mulf %156, %297 : vector<16x128xf32>
      %299 = arith.addf %293, %298 : vector<16x128xf32>
      %c46 = arith.constant 46 : index
      %300 = arith.index_cast %4 : i32 to index
      %c0_90 = arith.constant 0 : index
      %301 = vector.load %arg3[%c46, %300, %c0_90] : memref<60x32x128xbf16, #tpu.memory_space<vmem>>, vector<1x16x128xbf16>
      %302 = vector.shape_cast %301 : vector<1x16x128xbf16> to vector<16x128xbf16>
      %303 = arith.extf %302 : vector<16x128xbf16> to vector<16x128xf32>
      %304 = arith.mulf %161, %303 : vector<16x128xf32>
      %305 = arith.addf %299, %304 : vector<16x128xf32>
      %c7_91 = arith.constant 7 : index
      %306 = arith.index_cast %4 : i32 to index
      %c0_92 = arith.constant 0 : index
      %307 = vector.load %arg3[%c7_91, %306, %c0_92] : memref<60x32x128xbf16, #tpu.memory_space<vmem>>, vector<1x16x128xbf16>
      %308 = vector.shape_cast %307 : vector<1x16x128xbf16> to vector<16x128xbf16>
      %309 = arith.extf %308 : vector<16x128xbf16> to vector<16x128xf32>
      %310 = arith.mulf %166, %309 : vector<16x128xf32>
      %311 = arith.addf %305, %310 : vector<16x128xf32>
      %c27 = arith.constant 27 : index
      %312 = arith.index_cast %4 : i32 to index
      %c0_93 = arith.constant 0 : index
      %313 = vector.load %arg3[%c27, %312, %c0_93] : memref<60x32x128xbf16, #tpu.memory_space<vmem>>, vector<1x16x128xbf16>
      %314 = vector.shape_cast %313 : vector<1x16x128xbf16> to vector<16x128xbf16>
      %315 = arith.extf %314 : vector<16x128xbf16> to vector<16x128xf32>
      %316 = arith.mulf %171, %315 : vector<16x128xf32>
      %317 = arith.addf %311, %316 : vector<16x128xf32>
      %c47 = arith.constant 47 : index
      %318 = arith.index_cast %4 : i32 to index
      %c0_94 = arith.constant 0 : index
      %319 = vector.load %arg3[%c47, %318, %c0_94] : memref<60x32x128xbf16, #tpu.memory_space<vmem>>, vector<1x16x128xbf16>
      %320 = vector.shape_cast %319 : vector<1x16x128xbf16> to vector<16x128xbf16>
      %321 = arith.extf %320 : vector<16x128xbf16> to vector<16x128xf32>
      %322 = arith.mulf %176, %321 : vector<16x128xf32>
      %323 = arith.addf %317, %322 : vector<16x128xf32>
      %324 = arith.mulf %323, %110 : vector<16x128xf32>
      %c1_95 = arith.constant 1 : index
      %325 = arith.index_cast %4 : i32 to index
      %c0_96 = arith.constant 0 : index
      %326 = vector.load %arg4[%c1_95, %325, %c0_96] : memref<6x32x128xf32, #tpu.memory_space<vmem>>, vector<1x16x128xf32>
      %327 = vector.shape_cast %326 : vector<1x16x128xf32> to vector<16x128xf32>
      %328 = vector.shape_cast %324 : vector<16x128xf32> to vector<1x16x128xf32>
      tpu.vector_store %arg4[%c1_95, %325, %c0_96], %328 {strides = array<i32>} : memref<6x32x128xf32, #tpu.memory_space<vmem>>, vector<1x16x128xf32>,
      %c8_97 = arith.constant 8 : index
      %329 = arith.index_cast %4 : i32 to index
      %c0_98 = arith.constant 0 : index
      %330 = vector.load %arg3[%c8_97, %329, %c0_98] : memref<60x32x128xbf16, #tpu.memory_space<vmem>>, vector<1x16x128xbf16>
      %331 = vector.shape_cast %330 : vector<1x16x128xbf16> to vector<16x128xbf16>
      %332 = arith.extf %331 : vector<16x128xbf16> to vector<16x128xf32>
      %333 = arith.mulf %121, %332 : vector<16x128xf32>
      %c28 = arith.constant 28 : index
      %334 = arith.index_cast %4 : i32 to index
      %c0_99 = arith.constant 0 : index
      %335 = vector.load %arg3[%c28, %334, %c0_99] : memref<60x32x128xbf16, #tpu.memory_space<vmem>>, vector<1x16x128xbf16>
      %336 = vector.shape_cast %335 : vector<1x16x128xbf16> to vector<16x128xbf16>
      %337 = arith.extf %336 : vector<16x128xbf16> to vector<16x128xf32>
      %338 = arith.mulf %126, %337 : vector<16x128xf32>
      %339 = arith.addf %333, %338 : vector<16x128xf32>
      %c48 = arith.constant 48 : index
      %340 = arith.index_cast %4 : i32 to index
      %c0_100 = arith.constant 0 : index
      %341 = vector.load %arg3[%c48, %340, %c0_100] : memref<60x32x128xbf16, #tpu.memory_space<vmem>>, vector<1x16x128xbf16>
      %342 = vector.shape_cast %341 : vector<1x16x128xbf16> to vector<16x128xbf16>
      %343 = arith.extf %342 : vector<16x128xbf16> to vector<16x128xf32>
      %344 = arith.mulf %131, %343 : vector<16x128xf32>
      %345 = arith.addf %339, %344 : vector<16x128xf32>
      %c9_101 = arith.constant 9 : index
      %346 = arith.index_cast %4 : i32 to index
      %c0_102 = arith.constant 0 : index
      %347 = vector.load %arg3[%c9_101, %346, %c0_102] : memref<60x32x128xbf16, #tpu.memory_space<vmem>>, vector<1x16x128xbf16>
      %348 = vector.shape_cast %347 : vector<1x16x128xbf16> to vector<16x128xbf16>
      %349 = arith.extf %348 : vector<16x128xbf16> to vector<16x128xf32>
      %350 = arith.mulf %136, %349 : vector<16x128xf32>
      %351 = arith.addf %345, %350 : vector<16x128xf32>
      %c29 = arith.constant 29 : index
      %352 = arith.index_cast %4 : i32 to index
      %c0_103 = arith.constant 0 : index
      %353 = vector.load %arg3[%c29, %352, %c0_103] : memref<60x32x128xbf16, #tpu.memory_space<vmem>>, vector<1x16x128xbf16>
      %354 = vector.shape_cast %353 : vector<1x16x128xbf16> to vector<16x128xbf16>
      %355 = arith.extf %354 : vector<16x128xbf16> to vector<16x128xf32>
      %356 = arith.mulf %141, %355 : vector<16x128xf32>
      %357 = arith.addf %351, %356 : vector<16x128xf32>
      %c49 = arith.constant 49 : index
      %358 = arith.index_cast %4 : i32 to index
      %c0_104 = arith.constant 0 : index
      %359 = vector.load %arg3[%c49, %358, %c0_104] : memref<60x32x128xbf16, #tpu.memory_space<vmem>>, vector<1x16x128xbf16>
      %360 = vector.shape_cast %359 : vector<1x16x128xbf16> to vector<16x128xbf16>
      %361 = arith.extf %360 : vector<16x128xbf16> to vector<16x128xf32>
      %362 = arith.mulf %146, %361 : vector<16x128xf32>
      %363 = arith.addf %357, %362 : vector<16x128xf32>
      %c10_105 = arith.constant 10 : index
      %364 = arith.index_cast %4 : i32 to index
      %c0_106 = arith.constant 0 : index
      %365 = vector.load %arg3[%c10_105, %364, %c0_106] : memref<60x32x128xbf16, #tpu.memory_space<vmem>>, vector<1x16x128xbf16>
      %366 = vector.shape_cast %365 : vector<1x16x128xbf16> to vector<16x128xbf16>
      %367 = arith.extf %366 : vector<16x128xbf16> to vector<16x128xf32>
      %368 = arith.mulf %151, %367 : vector<16x128xf32>
      %369 = arith.addf %363, %368 : vector<16x128xf32>
      %c30 = arith.constant 30 : index
      %370 = arith.index_cast %4 : i32 to index
      %c0_107 = arith.constant 0 : index
      %371 = vector.load %arg3[%c30, %370, %c0_107] : memref<60x32x128xbf16, #tpu.memory_space<vmem>>, vector<1x16x128xbf16>
      %372 = vector.shape_cast %371 : vector<1x16x128xbf16> to vector<16x128xbf16>
      %373 = arith.extf %372 : vector<16x128xbf16> to vector<16x128xf32>
      %374 = arith.mulf %156, %373 : vector<16x128xf32>
      %375 = arith.addf %369, %374 : vector<16x128xf32>
      %c50 = arith.constant 50 : index
      %376 = arith.index_cast %4 : i32 to index
      %c0_108 = arith.constant 0 : index
      %377 = vector.load %arg3[%c50, %376, %c0_108] : memref<60x32x128xbf16, #tpu.memory_space<vmem>>, vector<1x16x128xbf16>
      %378 = vector.shape_cast %377 : vector<1x16x128xbf16> to vector<16x128xbf16>
      %379 = arith.extf %378 : vector<16x128xbf16> to vector<16x128xf32>
      %380 = arith.mulf %161, %379 : vector<16x128xf32>
      %381 = arith.addf %375, %380 : vector<16x128xf32>
      %c11_109 = arith.constant 11 : index
      %382 = arith.index_cast %4 : i32 to index
      %c0_110 = arith.constant 0 : index
      %383 = vector.load %arg3[%c11_109, %382, %c0_110] : memref<60x32x128xbf16, #tpu.memory_space<vmem>>, vector<1x16x128xbf16>
      %384 = vector.shape_cast %383 : vector<1x16x128xbf16> to vector<16x128xbf16>
      %385 = arith.extf %384 : vector<16x128xbf16> to vector<16x128xf32>
      %386 = arith.mulf %166, %385 : vector<16x128xf32>
      %387 = arith.addf %381, %386 : vector<16x128xf32>
      %c31 = arith.constant 31 : index
      %388 = arith.index_cast %4 : i32 to index
      %c0_111 = arith.constant 0 : index
      %389 = vector.load %arg3[%c31, %388, %c0_111] : memref<60x32x128xbf16, #tpu.memory_space<vmem>>, vector<1x16x128xbf16>
      %390 = vector.shape_cast %389 : vector<1x16x128xbf16> to vector<16x128xbf16>
      %391 = arith.extf %390 : vector<16x128xbf16> to vector<16x128xf32>
      %392 = arith.mulf %171, %391 : vector<16x128xf32>
      %393 = arith.addf %387, %392 : vector<16x128xf32>
      %c51 = arith.constant 51 : index
      %394 = arith.index_cast %4 : i32 to index
      %c0_112 = arith.constant 0 : index
      %395 = vector.load %arg3[%c51, %394, %c0_112] : memref<60x32x128xbf16, #tpu.memory_space<vmem>>, vector<1x16x128xbf16>
      %396 = vector.shape_cast %395 : vector<1x16x128xbf16> to vector<16x128xbf16>
      %397 = arith.extf %396 : vector<16x128xbf16> to vector<16x128xf32>
      %398 = arith.mulf %176, %397 : vector<16x128xf32>
      %399 = arith.addf %393, %398 : vector<16x128xf32>
      %400 = arith.mulf %399, %110 : vector<16x128xf32>
      %c2_113 = arith.constant 2 : index
      %401 = arith.index_cast %4 : i32 to index
      %c0_114 = arith.constant 0 : index
      %402 = vector.load %arg4[%c2_113, %401, %c0_114] : memref<6x32x128xf32, #tpu.memory_space<vmem>>, vector<1x16x128xf32>
      %403 = vector.shape_cast %402 : vector<1x16x128xf32> to vector<16x128xf32>
      %404 = vector.shape_cast %400 : vector<16x128xf32> to vector<1x16x128xf32>
      tpu.vector_store %arg4[%c2_113, %401, %c0_114], %404 {strides = array<i32>} : memref<6x32x128xf32, #tpu.memory_space<vmem>>, vector<1x16x128xf32>,
      %c12 = arith.constant 12 : index
      %405 = arith.index_cast %4 : i32 to index
      %c0_115 = arith.constant 0 : index
      %406 = vector.load %arg3[%c12, %405, %c0_115] : memref<60x32x128xbf16, #tpu.memory_space<vmem>>, vector<1x16x128xbf16>
      %407 = vector.shape_cast %406 : vector<1x16x128xbf16> to vector<16x128xbf16>
      %408 = arith.extf %407 : vector<16x128xbf16> to vector<16x128xf32>
      %409 = arith.mulf %121, %408 : vector<16x128xf32>
      %c32 = arith.constant 32 : index
      %410 = arith.index_cast %4 : i32 to index
      %c0_116 = arith.constant 0 : index
      %411 = vector.load %arg3[%c32, %410, %c0_116] : memref<60x32x128xbf16, #tpu.memory_space<vmem>>, vector<1x16x128xbf16>
      %412 = vector.shape_cast %411 : vector<1x16x128xbf16> to vector<16x128xbf16>
      %413 = arith.extf %412 : vector<16x128xbf16> to vector<16x128xf32>
      %414 = arith.mulf %126, %413 : vector<16x128xf32>
      %415 = arith.addf %409, %414 : vector<16x128xf32>
      %c52 = arith.constant 52 : index
      %416 = arith.index_cast %4 : i32 to index
      %c0_117 = arith.constant 0 : index
      %417 = vector.load %arg3[%c52, %416, %c0_117] : memref<60x32x128xbf16, #tpu.memory_space<vmem>>, vector<1x16x128xbf16>
      %418 = vector.shape_cast %417 : vector<1x16x128xbf16> to vector<16x128xbf16>
      %419 = arith.extf %418 : vector<16x128xbf16> to vector<16x128xf32>
      %420 = arith.mulf %131, %419 : vector<16x128xf32>
      %421 = arith.addf %415, %420 : vector<16x128xf32>
      %c13 = arith.constant 13 : index
      %422 = arith.index_cast %4 : i32 to index
      %c0_118 = arith.constant 0 : index
      %423 = vector.load %arg3[%c13, %422, %c0_118] : memref<60x32x128xbf16, #tpu.memory_space<vmem>>, vector<1x16x128xbf16>
      %424 = vector.shape_cast %423 : vector<1x16x128xbf16> to vector<16x128xbf16>
      %425 = arith.extf %424 : vector<16x128xbf16> to vector<16x128xf32>
      %426 = arith.mulf %136, %425 : vector<16x128xf32>
      %427 = arith.addf %421, %426 : vector<16x128xf32>
      %c33 = arith.constant 33 : index
      %428 = arith.index_cast %4 : i32 to index
      %c0_119 = arith.constant 0 : index
      %429 = vector.load %arg3[%c33, %428, %c0_119] : memref<60x32x128xbf16, #tpu.memory_space<vmem>>, vector<1x16x128xbf16>
      %430 = vector.shape_cast %429 : vector<1x16x128xbf16> to vector<16x128xbf16>
      %431 = arith.extf %430 : vector<16x128xbf16> to vector<16x128xf32>
      %432 = arith.mulf %141, %431 : vector<16x128xf32>
      %433 = arith.addf %427, %432 : vector<16x128xf32>
      %c53 = arith.constant 53 : index
      %434 = arith.index_cast %4 : i32 to index
      %c0_120 = arith.constant 0 : index
      %435 = vector.load %arg3[%c53, %434, %c0_120] : memref<60x32x128xbf16, #tpu.memory_space<vmem>>, vector<1x16x128xbf16>
      %436 = vector.shape_cast %435 : vector<1x16x128xbf16> to vector<16x128xbf16>
      %437 = arith.extf %436 : vector<16x128xbf16> to vector<16x128xf32>
      %438 = arith.mulf %146, %437 : vector<16x128xf32>
      %439 = arith.addf %433, %438 : vector<16x128xf32>
      %c14 = arith.constant 14 : index
      %440 = arith.index_cast %4 : i32 to index
      %c0_121 = arith.constant 0 : index
      %441 = vector.load %arg3[%c14, %440, %c0_121] : memref<60x32x128xbf16, #tpu.memory_space<vmem>>, vector<1x16x128xbf16>
      %442 = vector.shape_cast %441 : vector<1x16x128xbf16> to vector<16x128xbf16>
      %443 = arith.extf %442 : vector<16x128xbf16> to vector<16x128xf32>
      %444 = arith.mulf %151, %443 : vector<16x128xf32>
      %445 = arith.addf %439, %444 : vector<16x128xf32>
      %c34 = arith.constant 34 : index
      %446 = arith.index_cast %4 : i32 to index
      %c0_122 = arith.constant 0 : index
      %447 = vector.load %arg3[%c34, %446, %c0_122] : memref<60x32x128xbf16, #tpu.memory_space<vmem>>, vector<1x16x128xbf16>
      %448 = vector.shape_cast %447 : vector<1x16x128xbf16> to vector<16x128xbf16>
      %449 = arith.extf %448 : vector<16x128xbf16> to vector<16x128xf32>
      %450 = arith.mulf %156, %449 : vector<16x128xf32>
      %451 = arith.addf %445, %450 : vector<16x128xf32>
      %c54 = arith.constant 54 : index
      %452 = arith.index_cast %4 : i32 to index
      %c0_123 = arith.constant 0 : index
      %453 = vector.load %arg3[%c54, %452, %c0_123] : memref<60x32x128xbf16, #tpu.memory_space<vmem>>, vector<1x16x128xbf16>
      %454 = vector.shape_cast %453 : vector<1x16x128xbf16> to vector<16x128xbf16>
      %455 = arith.extf %454 : vector<16x128xbf16> to vector<16x128xf32>
      %456 = arith.mulf %161, %455 : vector<16x128xf32>
      %457 = arith.addf %451, %456 : vector<16x128xf32>
      %c15 = arith.constant 15 : index
      %458 = arith.index_cast %4 : i32 to index
      %c0_124 = arith.constant 0 : index
      %459 = vector.load %arg3[%c15, %458, %c0_124] : memref<60x32x128xbf16, #tpu.memory_space<vmem>>, vector<1x16x128xbf16>
      %460 = vector.shape_cast %459 : vector<1x16x128xbf16> to vector<16x128xbf16>
      %461 = arith.extf %460 : vector<16x128xbf16> to vector<16x128xf32>
      %462 = arith.mulf %166, %461 : vector<16x128xf32>
      %463 = arith.addf %457, %462 : vector<16x128xf32>
      %c35 = arith.constant 35 : index
      %464 = arith.index_cast %4 : i32 to index
      %c0_125 = arith.constant 0 : index
      %465 = vector.load %arg3[%c35, %464, %c0_125] : memref<60x32x128xbf16, #tpu.memory_space<vmem>>, vector<1x16x128xbf16>
      %466 = vector.shape_cast %465 : vector<1x16x128xbf16> to vector<16x128xbf16>
      %467 = arith.extf %466 : vector<16x128xbf16> to vector<16x128xf32>
      %468 = arith.mulf %171, %467 : vector<16x128xf32>
      %469 = arith.addf %463, %468 : vector<16x128xf32>
      %c55 = arith.constant 55 : index
      %470 = arith.index_cast %4 : i32 to index
      %c0_126 = arith.constant 0 : index
      %471 = vector.load %arg3[%c55, %470, %c0_126] : memref<60x32x128xbf16, #tpu.memory_space<vmem>>, vector<1x16x128xbf16>
      %472 = vector.shape_cast %471 : vector<1x16x128xbf16> to vector<16x128xbf16>
      %473 = arith.extf %472 : vector<16x128xbf16> to vector<16x128xf32>
      %474 = arith.mulf %176, %473 : vector<16x128xf32>
      %475 = arith.addf %469, %474 : vector<16x128xf32>
      %476 = arith.mulf %475, %110 : vector<16x128xf32>
      %c3_127 = arith.constant 3 : index
      %477 = arith.index_cast %4 : i32 to index
      %c0_128 = arith.constant 0 : index
      %478 = vector.load %arg4[%c3_127, %477, %c0_128] : memref<6x32x128xf32, #tpu.memory_space<vmem>>, vector<1x16x128xf32>
      %479 = vector.shape_cast %478 : vector<1x16x128xf32> to vector<16x128xf32>
      %480 = vector.shape_cast %476 : vector<16x128xf32> to vector<1x16x128xf32>
      tpu.vector_store %arg4[%c3_127, %477, %c0_128], %480 {strides = array<i32>} : memref<6x32x128xf32, #tpu.memory_space<vmem>>, vector<1x16x128xf32>,
      %c16 = arith.constant 16 : index
      %481 = arith.index_cast %4 : i32 to index
      %c0_129 = arith.constant 0 : index
      %482 = vector.load %arg3[%c16, %481, %c0_129] : memref<60x32x128xbf16, #tpu.memory_space<vmem>>, vector<1x16x128xbf16>
      %483 = vector.shape_cast %482 : vector<1x16x128xbf16> to vector<16x128xbf16>
      %484 = arith.extf %483 : vector<16x128xbf16> to vector<16x128xf32>
      %485 = arith.mulf %121, %484 : vector<16x128xf32>
      %c36 = arith.constant 36 : index
      %486 = arith.index_cast %4 : i32 to index
      %c0_130 = arith.constant 0 : index
      %487 = vector.load %arg3[%c36, %486, %c0_130] : memref<60x32x128xbf16, #tpu.memory_space<vmem>>, vector<1x16x128xbf16>
      %488 = vector.shape_cast %487 : vector<1x16x128xbf16> to vector<16x128xbf16>
      %489 = arith.extf %488 : vector<16x128xbf16> to vector<16x128xf32>
      %490 = arith.mulf %126, %489 : vector<16x128xf32>
      %491 = arith.addf %485, %490 : vector<16x128xf32>
      %c56 = arith.constant 56 : index
      %492 = arith.index_cast %4 : i32 to index
      %c0_131 = arith.constant 0 : index
      %493 = vector.load %arg3[%c56, %492, %c0_131] : memref<60x32x128xbf16, #tpu.memory_space<vmem>>, vector<1x16x128xbf16>
      %494 = vector.shape_cast %493 : vector<1x16x128xbf16> to vector<16x128xbf16>
      %495 = arith.extf %494 : vector<16x128xbf16> to vector<16x128xf32>
      %496 = arith.mulf %131, %495 : vector<16x128xf32>
      %497 = arith.addf %491, %496 : vector<16x128xf32>
      %c17 = arith.constant 17 : index
      %498 = arith.index_cast %4 : i32 to index
      %c0_132 = arith.constant 0 : index
      %499 = vector.load %arg3[%c17, %498, %c0_132] : memref<60x32x128xbf16, #tpu.memory_space<vmem>>, vector<1x16x128xbf16>
      %500 = vector.shape_cast %499 : vector<1x16x128xbf16> to vector<16x128xbf16>
      %501 = arith.extf %500 : vector<16x128xbf16> to vector<16x128xf32>
      %502 = arith.mulf %136, %501 : vector<16x128xf32>
      %503 = arith.addf %497, %502 : vector<16x128xf32>
      %c37 = arith.constant 37 : index
      %504 = arith.index_cast %4 : i32 to index
      %c0_133 = arith.constant 0 : index
      %505 = vector.load %arg3[%c37, %504, %c0_133] : memref<60x32x128xbf16, #tpu.memory_space<vmem>>, vector<1x16x128xbf16>
      %506 = vector.shape_cast %505 : vector<1x16x128xbf16> to vector<16x128xbf16>
      %507 = arith.extf %506 : vector<16x128xbf16> to vector<16x128xf32>
      %508 = arith.mulf %141, %507 : vector<16x128xf32>
      %509 = arith.addf %503, %508 : vector<16x128xf32>
      %c57 = arith.constant 57 : index
      %510 = arith.index_cast %4 : i32 to index
      %c0_134 = arith.constant 0 : index
      %511 = vector.load %arg3[%c57, %510, %c0_134] : memref<60x32x128xbf16, #tpu.memory_space<vmem>>, vector<1x16x128xbf16>
      %512 = vector.shape_cast %511 : vector<1x16x128xbf16> to vector<16x128xbf16>
      %513 = arith.extf %512 : vector<16x128xbf16> to vector<16x128xf32>
      %514 = arith.mulf %146, %513 : vector<16x128xf32>
      %515 = arith.addf %509, %514 : vector<16x128xf32>
      %c18 = arith.constant 18 : index
      %516 = arith.index_cast %4 : i32 to index
      %c0_135 = arith.constant 0 : index
      %517 = vector.load %arg3[%c18, %516, %c0_135] : memref<60x32x128xbf16, #tpu.memory_space<vmem>>, vector<1x16x128xbf16>
      %518 = vector.shape_cast %517 : vector<1x16x128xbf16> to vector<16x128xbf16>
      %519 = arith.extf %518 : vector<16x128xbf16> to vector<16x128xf32>
      %520 = arith.mulf %151, %519 : vector<16x128xf32>
      %521 = arith.addf %515, %520 : vector<16x128xf32>
      %c38 = arith.constant 38 : index
      %522 = arith.index_cast %4 : i32 to index
      %c0_136 = arith.constant 0 : index
      %523 = vector.load %arg3[%c38, %522, %c0_136] : memref<60x32x128xbf16, #tpu.memory_space<vmem>>, vector<1x16x128xbf16>
      %524 = vector.shape_cast %523 : vector<1x16x128xbf16> to vector<16x128xbf16>
      %525 = arith.extf %524 : vector<16x128xbf16> to vector<16x128xf32>
      %526 = arith.mulf %156, %525 : vector<16x128xf32>
      %527 = arith.addf %521, %526 : vector<16x128xf32>
      %c58 = arith.constant 58 : index
      %528 = arith.index_cast %4 : i32 to index
      %c0_137 = arith.constant 0 : index
      %529 = vector.load %arg3[%c58, %528, %c0_137] : memref<60x32x128xbf16, #tpu.memory_space<vmem>>, vector<1x16x128xbf16>
      %530 = vector.shape_cast %529 : vector<1x16x128xbf16> to vector<16x128xbf16>
      %531 = arith.extf %530 : vector<16x128xbf16> to vector<16x128xf32>
      %532 = arith.mulf %161, %531 : vector<16x128xf32>
      %533 = arith.addf %527, %532 : vector<16x128xf32>
      %c19 = arith.constant 19 : index
      %534 = arith.index_cast %4 : i32 to index
      %c0_138 = arith.constant 0 : index
      %535 = vector.load %arg3[%c19, %534, %c0_138] : memref<60x32x128xbf16, #tpu.memory_space<vmem>>, vector<1x16x128xbf16>
      %536 = vector.shape_cast %535 : vector<1x16x128xbf16> to vector<16x128xbf16>
      %537 = arith.extf %536 : vector<16x128xbf16> to vector<16x128xf32>
      %538 = arith.mulf %166, %537 : vector<16x128xf32>
      %539 = arith.addf %533, %538 : vector<16x128xf32>
      %c39 = arith.constant 39 : index
      %540 = arith.index_cast %4 : i32 to index
      %c0_139 = arith.constant 0 : index
      %541 = vector.load %arg3[%c39, %540, %c0_139] : memref<60x32x128xbf16, #tpu.memory_space<vmem>>, vector<1x16x128xbf16>
      %542 = vector.shape_cast %541 : vector<1x16x128xbf16> to vector<16x128xbf16>
      %543 = arith.extf %542 : vector<16x128xbf16> to vector<16x128xf32>
      %544 = arith.mulf %171, %543 : vector<16x128xf32>
      %545 = arith.addf %539, %544 : vector<16x128xf32>
      %c59 = arith.constant 59 : index
      %546 = arith.index_cast %4 : i32 to index
      %c0_140 = arith.constant 0 : index
      %547 = vector.load %arg3[%c59, %546, %c0_140] : memref<60x32x128xbf16, #tpu.memory_space<vmem>>, vector<1x16x128xbf16>
      %548 = vector.shape_cast %547 : vector<1x16x128xbf16> to vector<16x128xbf16>
      %549 = arith.extf %548 : vector<16x128xbf16> to vector<16x128xf32>
      %550 = arith.mulf %176, %549 : vector<16x128xf32>
      %551 = arith.addf %545, %550 : vector<16x128xf32>
      %552 = arith.mulf %551, %110 : vector<16x128xf32>
      %c4_141 = arith.constant 4 : index
      %553 = arith.index_cast %4 : i32 to index
      %c0_142 = arith.constant 0 : index
      %554 = vector.load %arg4[%c4_141, %553, %c0_142] : memref<6x32x128xf32, #tpu.memory_space<vmem>>, vector<1x16x128xf32>
      %555 = vector.shape_cast %554 : vector<1x16x128xf32> to vector<16x128xf32>
      %556 = vector.shape_cast %552 : vector<16x128xf32> to vector<1x16x128xf32>
      tpu.vector_store %arg4[%c4_141, %553, %c0_142], %556 {strides = array<i32>} : memref<6x32x128xf32, #tpu.memory_space<vmem>>, vector<1x16x128xf32>,
    }
    %c2_i32_0 = arith.constant 2 : i32
    return
  }
  func.func @transform_0(%arg0: i32) -> (i32, i32, i32) {
    %c0_i32 = arith.constant 0 : i32
    %c0_i32_0 = arith.constant 0 : i32
    %c0_i32_1 = arith.constant 0 : i32
    return %c0_i32, %arg0, %c0_i32_0 : i32, i32, i32
  }
  func.func @transform_1(%arg0: i32) -> (i32, i32, i32) {
    %c0_i32 = arith.constant 0 : i32
    %c0_i32_0 = arith.constant 0 : i32
    %c0_i32_1 = arith.constant 0 : i32
    return %c0_i32, %arg0, %c0_i32_0 : i32, i32, i32
  }
  func.func @transform_2(%arg0: i32) -> (i32, i32, i32) {
    %c0_i32 = arith.constant 0 : i32
    %c0_i32_0 = arith.constant 0 : i32
    %c0_i32_1 = arith.constant 0 : i32
    return %c0_i32, %arg0, %c0_i32_0 : i32, i32, i32
  }
  func.func @transform_3(%arg0: i32) -> (i32, i32, i32) {
    %c0_i32 = arith.constant 0 : i32
    %c0_i32_0 = arith.constant 0 : i32
    %c0_i32_1 = arith.constant 0 : i32
    return %c0_i32, %arg0, %c0_i32_0 : i32, i32, i32
  }
}

</mosaic_0001>

<bundles_post_ra>
// kernel: tpu_custom_call.1
= control target key start
LH: loop header
LB: loop body
LE: loop exit
PB: predicated region body
PF: predicated region fallthrough
CT: control target
= control target key end

     0   :  { %8 = vsyncpa [#allocation3], 0  ;;  %s3454_s0 = inlined_call_operand.hbm [shape: f32[8,64,128], index: 0, kind: input, shape index: {}]   ;;  %s3455_s1 = inlined_call_operand.hbm [shape: bf16[12,64,128], index: 1, kind: input, shape index: {}]   ;;  %s3456_s2 = inlined_call_operand.hbm [shape: bf16[60,64,128], index: 2, kind: input, shape index: {}]   ;;  %s3457_s3 = inlined_call_operand.hbm [shape: f32[6,64,128], index: 3, kind: output, shape index: {}]  }
   0x1   :  { %10 = vsyncpa [#allocation3 + $0x1], 0 }
   0x2   :  { %11 = vsyncpa [#allocation6], 0 }
   0x3   :  { %13 = vsyncpa [#allocation6 + $0x1], 0 }
   0x4   :  { %14 = vsyncpa [#allocation4], 0 }
   0x5   :  { %16 = vsyncpa [#allocation4 + $0x1], 0  ;;  %s2567_s12 = smov 0   ;;  %s2569_s13 = smov 0  }
   0x6   :  { %s2571_s14 = smov 0   ;;  %s2573_s15 = smov 0  }
   0x7 LB: > { %s2588_s16 = sadd.s32 4294967295, %s2518_s15   ;;  %s1692_s17 = sadd.s32 4294967294, %s2518_s15   ;;  %s2518_s15 = sphi %s2573_s15, %s3506_s15   ;;  %s2514_s14 = sphi %s2571_s14, %s3505_s14   ;;  %s2510_s13 = sphi %s2569_s13, %s3504_s13   ;;  %s2506_s12 = sphi %s2567_s12, %s3503_s12  }
   0x8   : > { %s2592_s18 = sadd.s32 1, %s2518_s15   ;;  %s29_s19 = sadd.s32 1, %s2514_s14 }
   0x9   : > { %s26_s20 = ssub.s32 %s2518_s15, %s2592_s18  ;;  %p36_p0 = scmp.ne.s32.totalorder %s2514_s14, %s2510_s13 }
   0xa   : > { %p27_p1 = scmp.eq.s32.totalorder %s26_s20, 0  ;;  %p37_p2 = scmp.eq.s32.totalorder %s2518_s15, 0 }
   0xb   : > { %p42_p3 = scmp.ne.s32.totalorder %s2510_s13, %s2506_s12  ;;  %p43_p4 = scmp.eq.s32.totalorder %s2588_s16, 0 }
   0xc   : > { %s2604_s21 = scalar_select %p27_p1, %s2514_s14, %s29_s19  }
   0xd   : > { %p2606_p5 = por %p37_p2, %p36_p0  ;;  %p2610_p6 = por %p43_p4, %p42_p3 }
   0xe   : > { %p118_p7 = scmp.eq.s32.totalorder %s2588_s16, 1  ;;  %p124_p8 = scmp.eq.s32.totalorder %s1692_s17, 1 }
   0xf   : > { %p1694_p11 = scmp.ge.s32.totalorder %s2518_s15, 2 }
  0x10   : > { %p2615_p9 = por %p118_p7, %p36_p0  ;;  %p2619_p10 = por %p124_p8, %p42_p3 }
  0x11   : > { %140 = sbr.rel (%p1694_p11) target bundleno = 60 (0x3c), region = 16 }
  0x16   : > { %s2627_s26 = sand.u32 1, %s2514_s14   ;;  %s1963_s27 = sshll.u32 %s2518_s15, 9 }
  0x17   : > { %s1695_s28 = sshll.u32 %s2627_s26, 8  ;;  %s154_s4 = scalar_lea.hbm %s3454_s0, %s1963_s27 }
  0x18   : > { %s2329_s5 = scalar_select %p2606_p5, [#allocation0], [#allocation17] }
  0x19   : > { %s148_s6 = scalar_lea.vmem [#allocation2], %s1695_s28  ;;  %s2524_s9 = smov 1024  }
  0x1a   : > { %s167_s7 = sshll.u32 %s148_s6, 4  ;;  %s159_s8 = sld [smem:[%s2329_s5]]   ;;  %s168_s7 = int_to_ptr.vmem [resolvable:$true] %s167_s7 }
  0x1b   : > { %2330 = sst [smem:[#allocation10]] (%p2606_p5), %s2524_s9  ;;  %s2525_s10 = smov 512  }
  0x1c   : > { %2331 = sst [smem:[#allocation10 + $0x1]] (%p2606_p5), %s2525_s10  ;;  %s2526_s11 = smov 4  }
  0x1d   : > { %2332 = sst [smem:[#allocation10 + $0x2]] (%p2606_p5), %s2526_s11  ;;  %s2527_s17 = smov 128  }
  0x1e   : > { %2333 = sst [smem:[#allocation10 + $0x3]] (%p2606_p5), %s2527_s17  ;;  %s2528_s20 = smov 8  }
  0x1f   : > { %2334 = sst [smem:[#allocation10 + $0x4]] (%p2606_p5), %s2527_s17  ;;  %s145_s28 = scalar_lea.sflag [#allocation3], %s2627_s26 }
  0x20   : > { %s1698_s19 = sshll.u32 %s159_s8, 26  ;;  %2335 = sst [smem:[#allocation10 + $0x5]] (%p2606_p5), %s2528_s20 }
  0x21   : > { %s1699_s27 = sadd.s32 134217728, %s1698_s19  ;;  %s2529_s29 = smov 131072  }
  0x22   : > { %2336 = dma.general (%p2606_p5), %s154_s4, 4096, %s168_s7, %s145_s28, %s2529_s29, [#allocation10], %s1699_s27, 0  }
  0x23   : > { %s190_s30 = sand.u32 1, %s2518_s15   ;;  %s2325_s5 = smul.u32 192, %s2627_s26 }
  0x24   : > { %s1964_s6 = sshll.u32 %s2518_s15, 8  ;;  %s2530_s19 = smov 512  }
  0x25   : > { %s2337_s8 = scalar_select %p2606_p5, [#allocation0], [#allocation18] }
  0x26   : > { %s200_s11 = scalar_lea.hbm %s3455_s1, %s1964_s6  ;;  %s194_s7 = scalar_lea.vmem [#allocation5], %s2325_s5 }
  0x27   : > { %s205_s4 = sld [smem:[%s2337_s8]]   ;;  %s213_s17 = sshll.u32 %s194_s7, 4  ;;  %s214_s17 = int_to_ptr.vmem [resolvable:$true] %s213_s17 }
  0x28   : > { %2338 = sst [smem:[#allocation12]] (%p2606_p5), %s2530_s19  ;;  %s2531_s20 = smov 256  }
  0x29   : > { %2339 = sst [smem:[#allocation12 + $0x1]] (%p2606_p5), %s2531_s20  ;;  %s2532_s27 = smov 4  }
  0x2a   : > { %2340 = sst [smem:[#allocation12 + $0x2]] (%p2606_p5), %s2532_s27  ;;  %s2533_s28 = smov 64  }
  0x2b   : > { %2341 = sst [smem:[#allocation12 + $0x3]] (%p2606_p5), %s2533_s28  ;;  %s191_s8 = scalar_lea.sflag [#allocation6], %s190_s30 }
  0x2c   : > { %2342 = sst [smem:[#allocation12 + $0x4]] (%p2606_p5), %s2533_s28  ;;  %s2534_s9 = smov 131072  }
  0x2d   : > { %s1702_s29 = sshll.u32 %s205_s4, 26  ;;  %2343 = sst [smem:[#allocation12 + $0x5]] (%p2606_p5), %s2532_s27 }
  0x2e   : > { %s1703_s5 = sadd.s32 134217728, %s1702_s29 }
  0x2f   : > { %2344 = dma.general (%p2606_p5), %s200_s11, 3072, %s214_s17, %s191_s8, %s2534_s9, [#allocation12], %s1703_s5, 0  }
  0x30   : > { %s2326_s10 = smul.u32 960, %s2627_s26  ;;  %s246_s4 = scalar_lea.hbm %s3456_s2, %s1964_s6 }
  0x31   : > { %s2345_s7 = scalar_select %p2606_p5, [#allocation0], [#allocation19] }
  0x32   : > { %s240_s30 = scalar_lea.vmem [#allocation7], %s2326_s10  ;;  %s2535_s11 = smov 512  }
  0x33   : > { %s251_s27 = sld [smem:[%s2345_s7]]   ;;  %s259_s28 = sshll.u32 %s240_s30, 4  ;;  %s260_s28 = int_to_ptr.vmem [resolvable:$true] %s259_s28 }
  0x34   : > { %2346 = sst [smem:[#allocation14]] (%p2606_p5), %s2535_s11  ;;  %s2536_s17 = smov 256  }
  0x35   : > { %2347 = sst [smem:[#allocation14 + $0x1]] (%p2606_p5), %s2536_s17  ;;  %s2537_s26 = smov 4  }
  0x36   : > { %2348 = sst [smem:[#allocation14 + $0x2]] (%p2606_p5), %s2537_s26  ;;  %s2538_s29 = smov 64  }
  0x37   : > { %2349 = sst [smem:[#allocation14 + $0x3]] (%p2606_p5), %s2538_s29  ;;  %s2539_s9 = smov 131072  }
  0x38   : > { %2350 = sst [smem:[#allocation14 + $0x4]] (%p2606_p5), %s2538_s29 }
  0x39   : > { %s1706_s5 = sshll.u32 %s251_s27, 26  ;;  %2351 = sst [smem:[#allocation14 + $0x5]] (%p2606_p5), %s2537_s26 }
  0x3a   : > { %s1707_s6 = sadd.s32 134217728, %s1706_s5 }
  0x3b   : > { %2352 = dma.general (%p2606_p5), %s246_s4, 15360, %s260_s28, %s191_s8, %s2539_s9, [#allocation14], %s1707_s6, 0  }
  0x3c PF: > { %p1708_p12 = scmp.ge.s32.totalorder %s2518_s15, 1  ;;  %p280_p13 = scmp.lt.s32.totalorder %s2518_s15, 3 }
  0x3e   : > { %p281_p0 = pnand %p1708_p12, %p280_p13 }
  0x3f   : > { %s2696_s10 = sand.u32 (!%p281_p0), 1, %s2510_s13  }
  0x40   : > { %284 = sbr.rel (%p281_p0) target bundleno = 242 (0xf2), region = 32  ;;  %s1709_s7 = sshll.u32 (!%p281_p0), %s2696_s10, 8 }
  0x41   : > { %s287_s19 = scalar_lea.sflag (!%p281_p0), [#allocation3], %s2696_s10  ;;  %s2700_s20 = scalar_lea.vmem (!%p281_p0), [#allocation2], %s1709_s7 }
  0x45   : > { %2493 = dma.done.wait (%p2610_p6), %s287_s19, 4096  }
  0x46   : > { %2495 = vsyncadd (%p2610_p6), %s287_s19, 4294963200  ;;  %s295_s22 = sand.u32 1, %s2588_s16   ;;  %s2327_s8 = smul.u32 192, %s2696_s10 }
  0x47   : > { %s296_s4 = scalar_lea.sflag [#allocation6], %s295_s22 }
  0x48   : > { %s2708_s27 = scalar_lea.vmem [#allocation5], %s2327_s8 }
  0x49   : > { %2497 = dma.done.wait (%p2610_p6), %s296_s4, 18432  }
  0x4a   : > { %2499 = vsyncadd (%p2610_p6), %s296_s4, 4294948864  ;;  %s2328_s30 = smul.u32 960, %s2696_s10  ;;  %s2717_s11 = scalar_lea.vmem [#allocation8], %s2327_s8 }
  0x4b   : > { %s2719_s17 = smov 0  }
  0x4c   : > { %s2715_s28 = scalar_lea.vmem [#allocation7], %s2328_s30 }
  0x4d LB: >> { %s2725_s26 = sshll.u32 %s2522_s17, 4  ;;  %s350_s17 = sadd.s32 1, %s2522_s17   ;;  %s2522_s17 = sphi %s2719_s17, %s350_s17  }
  0x4e   : >> { %s2729_s23 = scalar_lea.vmem %s2700_s20, %s2725_s26 [#allocation2]  ;;  %s508_s29 = sshra.s32 %s2725_s26, 3 }
  0x4f   : >> { %v353_v0 = vld [vmem:[%s2729_s23] sm:$0xff]  ;;  %s2739_s5 = sshll.u32 %s508_s29, 2  ;;  %v354_v39 = vld [vmem:[%s2729_s23 + $0x8] sm:$0xff]  ;;  %s3097_s7 = scalar_lea.vmem %s2717_s11, %s2725_s26 [#allocation8] }
  0x50   : >> { %v1712_v1 = vld [vmem:[%s2729_s23 + $0x80] sm:$0xff]  ;;  %v359_v3 = vmul.f32 -49.99995, %v353_v0  ;;  %s2746_s6 = scalar_lea.vmem %s2708_s27, %s2739_s5 [#allocation5]  ;;  %v1713_v40 = vld [vmem:[%s2729_s23 + $0x88] sm:$0xff]  ;;  %v360_v43 = vmul.f32 -49.99995, %v354_v39  ;;  %s2820_s9 = scalar_lea.vmem %s2715_s28, %s2739_s5 [#allocation7] }
  0x51   : >> { %v1715_v2 = vld [vmem:[%s2729_s23 + $0x20] sm:$0xff]  ;;  %v367_v4 = vsub.f32 100.0, %v1712_v1  ;;  %v2754_v20 = vld [vmem:[%s2746_s6 + $0x10] sm:$0xff]   ;;  %v1716_v41 = vld [vmem:[%s2729_s23 + $0x28] sm:$0xff]  ;;  %v368_v44 = vsub.f32 100.0, %v1713_v40  ;;  %p347_p1 = scmp.ge.s32.totalorder %s350_s17, 2  }
  0x52   : >> { %v1718_v5 = vld [vmem:[%s2729_s23 + $0xa0] sm:$0xff]  ;;  %v379_v6 = vmul.f32 -49.99995, %v1715_v2  ;;  %2432 = vtanh.f32 %v359_v3  ;;  %v2760_v22 = vld [vmem:[%s2746_s6 + $0x30] sm:$0xff]   ;;  %v1973_v29 = vunpack.c.l.bf16 %v2754_v20  ;;  %v1719_v45 = vld [vmem:[%s2729_s23 + $0xa8] sm:$0xff]  ;;  %s1281_s19 = scalar_lea.sflag (%p347_p1), [#allocation4], %s2696_s10 }
  0x53   : >> { %v387_v7 = vsub.f32 100.0, %v1718_v5  ;;  %v1721_v8 = vld [vmem:[%s2729_s23 + $0x40] sm:$0xff]  ;;  %v2741_v11 = vmul.f32 0.01010101, %v367_v4  ;;  %v2768_v26 = vld [vmem:[%s2746_s6 + $0x50] sm:$0xff]   ;;  %v1981_v35 = vunpack.c.l.bf16 %v2760_v22  ;;  %v388_v50 = vsub.f32 100.0, %v1719_v45 }
  0x54   : >> { %v1724_v9 = vld [vmem:[%s2729_s23 + $0xc0] sm:$0xff]  ;;  %v399_v12 = vmul.f32 -49.99995, %v1721_v8  ;;  %2434 = vtanh.f32 %v379_v6  ;;  %v2777_v31 = vld [vmem:[%s2746_s6 + $0x70] sm:$0xff]   ;;  %v1989_v37 = vunpack.c.l.bf16 %v2768_v26  ;;  %v380_v46 = vmul.f32 -49.99995, %v1716_v41 }
  0x55   : >> { %v1727_v10 = vld [vmem:[%s2729_s23 + $0x60] sm:$0xff]  ;;  %v407_v13 = vsub.f32 100.0, %v1724_v9  ;;  %v2748_v15 = vmul.f32 0.01010101, %v387_v7  ;;  %v2787_v38 = vld [vmem:[%s2746_s6 + $0x90] sm:$0xff]   ;;  %v1997_v48 = vunpack.c.l.bf16 %v2777_v31  ;;  %v1722_v51 = vld [vmem:[%s2729_s23 + $0x48] sm:$0xff] }
  0x56   : >> { %v1730_v14 = vld [vmem:[%s2729_s23 + $0xe0] sm:$0xff]  ;;  %v419_v16 = vmul.f32 -49.99995, %v1727_v10  ;;  %2436 = vtanh.f32 %v399_v12  ;;  %3473 = vst [vmem:[#allocation23_spill] sm:$0xff] %v2787_v38  ;;  %v1725_v52 = vld [vmem:[%s2729_s23 + $0xc8] sm:$0xff]  ;;  %v2005_v61 = vunpack.c.l.bf16 %v2787_v38 }
  0x57   : >> { %v427_v17 = vsub.f32 100.0, %v1730_v14  ;;  %v2751_v18 = vld [vmem:[%s2746_s6] sm:$0xff]   ;;  %v409_v19 = vmul.f32 0.01010101, %v407_v13  ;;  %v431_v24 = vmax.f32 %v2741_v11, %v2748_v15  ;;  %v1728_v53 = vld [vmem:[%s2729_s23 + $0x68] sm:$0xff]  ;;  %v408_v56 = vsub.f32 100.0, %v1725_v52 }
  0x58   : >> { %v2757_v21 = vld [vmem:[%s2746_s6 + $0x20] sm:$0xff]   ;;  %2438 = vtanh.f32 %v419_v16  ;;  %v1969_v28 = vunpack.c.l.bf16 %v2751_v18  ;;  %v2799_v54 = vmul.f32 0.01010101, %v368_v44  ;;  %v400_v55 = vmul.f32 -49.99995, %v1722_v51  ;;  %v1731_v57 = vld [vmem:[%s2729_s23 + $0xe8] sm:$0xff] }
  0x59   : >> { %v429_v23 = vmul.f32 0.01010101, %v427_v17  ;;  %v2765_v25 = vld [vmem:[%s2746_s6 + $0x40] sm:$0xff]   ;;  %v1977_v30 = vunpack.c.l.bf16 %v2757_v21  ;;  %v433_v34 = vmax.f32 %v431_v24, %v409_v19  ;;  %2440 = vtanh.f32 %v360_v43 }
  0x5a   : >> { %v2771_v27 = vld [vmem:[%s2746_s6 + $0x60] sm:$0xff]   ;;  %v1985_v36 = vunpack.c.l.bf16 %v2765_v25  ;;  %2442 = vtanh.f32 %v380_v46  ;;  %v2802_v59 = vmul.f32 0.01010101, %v388_v50  ;;  %v420_v60 = vmul.f32 -49.99995, %v1728_v53 }
  0x5b   : >> { %v2780_v32 = vld [vmem:[%s2746_s6 + $0x80] sm:$0xff]   ;;  %v1993_v42 = vunpack.c.l.bf16 %v2771_v27  ;;  %v435_v47 = vmax.f32 %v433_v34, %v429_v23  ;;  %2444 = vtanh.f32 %v400_v55  ;;  %v2805_v62 = vmul.f32 0.01010101, %v408_v56 }
  0x5c   : >> { %v2001_v49 = vunpack.c.l.bf16 %v2780_v32  ;;  %v428_v63 = vsub.f32 100.0, %v1731_v57  ;;  %2446 = vtanh.f32 %v420_v60  ;;  %v432_v5 = vmax.f32 %v2799_v54, %v2802_v59  ;;  %v2824_v53 = vld [vmem:[%s2746_s6 + $0xa0] sm:$0xff]  }
  0x5d   : >> { %v437_v58 = vmax.f32 %v435_v47, 1e-10  ;;  %3474 = vst [vmem:[#allocation24_spill] sm:$0xff] %v2824_v53  ;;  %v2892_v47 = vld [vmem:[%s2820_s9 + $0x2b0] sm:$0xff]  }
  0x5e   : >> { %3476 = vst [vmem:[#allocation26_spill] sm:$0xff] %v2892_v47 }
  0x5f   : >> { %v439_v0 = vsub.f32 %v2741_v11, %v437_v58  ;;  %v449_v1 = vsub.f32 %v2748_v15, %v437_v58  ;;  %v459_v2 = vsub.f32 %v409_v19, %v437_v58  ;;  %v469_v3 = vsub.f32 %v429_v23, %v437_v58  ;;  %v2433_v7 = vpop.eup %2432 }
  0x60   : >> { %v479_v4 = vsub.f32 1e-10, %v437_v58  ;;  %v363_v14 = vadd.f32 1.0, %v2433_v7  ;;  %v430_v11 = vmul.f32 0.01010101, %v428_v63  ;;  %v434_v15 = vmax.f32 %v432_v5, %v2805_v62  ;;  %v2832_v58 = vld [vmem:[%s2746_s6 + $0xb0] sm:$0xff]  }
  0x61   : >> { %v441_v8 = vmul.f32 10.0, %v439_v0  ;;  %v451_v9 = vmul.f32 10.0, %v449_v1  ;;  %v461_v10 = vmul.f32 10.0, %v459_v2  ;;  %v471_v12 = vmul.f32 10.0, %v469_v3  ;;  %v2435_v13 = vpop.eup %2434  ;;  %v2841_v5 = vld [vmem:[%s2820_s9] sm:$0xff]  }
  0x62   : >> { %v481_v16 = vmul.f32 10.0, %v479_v4  ;;  %v383_v19 = vadd.f32 1.0, %v2435_v13  ;;  %v2816_v50 = vmul.f32 0.5, %v363_v14  ;;  %v436_v51 = vmax.f32 %v434_v15, %v430_v11  ;;  %v2848_v13 = vld [vmem:[%s2820_s9 + $0x140] sm:$0xff]  }
  0x63   : >> { %v2437_v17 = vpop.eup %2436  ;;  %v443_v23 = vmul.f32 1.442695, %v441_v8  ;;  %v453_v24 = vmul.f32 1.442695, %v451_v9  ;;  %v463_v41 = vmul.f32 1.442695, %v461_v10 }
  0x64   : >> { %v403_v40 = vadd.f32 1.0, %v2437_v17  ;;  %v473_v43 = vmul.f32 1.442695, %v471_v12  ;;  %v483_v46 = vmul.f32 1.442695, %v481_v16  ;;  %v2826_v55 = vmul.f32 0.5, %v383_v19 }
  0x65   : >> { %v2439_v39 = vpop.eup %2438  ;;  %2448 = vpow2.f32 %v443_v23  ;;  %v438_v63 = vmax.f32 %v436_v51, 1e-10  ;;  %v2851_v23 = vld [vmem:[%s2820_s9 + $0x280] sm:$0xff]   ;;  %v2862_v51 = vld [vmem:[%s2820_s9 + $0x290] sm:$0xff]  }
  0x66   : >> { %v423_v45 = vadd.f32 1.0, %v2439_v39  ;;  %2450 = vpow2.f32 %v453_v24  ;;  %v2828_v56 = vmul.f32 0.5, %v403_v40  ;;  %v2441_v1 = vpop.eup %2440  ;;  %v2858_v40 = vld [vmem:[%s2820_s9 + $0x150] sm:$0xff]   ;;  %v2872_v3 = vld [vmem:[%s2820_s9 + $0x2a0] sm:$0xff]  }
  0x67   : >> { %2452 = vpow2.f32 %v463_v41  ;;  %v2443_v7 = vpop.eup %2442  ;;  %v440_v8 = vsub.f32 %v2799_v54, %v438_v63  ;;  %v450_v9 = vsub.f32 %v2802_v59, %v438_v63  ;;  %v460_v10 = vsub.f32 %v2805_v62, %v438_v63  ;;  %v2855_v62 = vld [vmem:[%s2820_s9 + $0x10] sm:$0xff]  }
  0x68   : >> { %v2834_v60 = vmul.f32 0.5, %v423_v45  ;;  %2454 = vpow2.f32 %v473_v43  ;;  %v2445_v14 = vpop.eup %2444  ;;  %v364_v16 = vadd.f32 1.0, %v2441_v1  ;;  %v384_v15 = vadd.f32 1.0, %v2443_v7  ;;  %v2868_v1 = vld [vmem:[%s2820_s9 + $0x160] sm:$0xff]  }
  0x69   : >> { %2456 = vpow2.f32 %v483_v46  ;;  %v470_v17 = vsub.f32 %v430_v11, %v438_v63  ;;  %v480_v19 = vsub.f32 1e-10, %v438_v63  ;;  %v404_v54 = vadd.f32 1.0, %v2445_v14  ;;  %v2447_v41 = vpop.eup %2446  ;;  %v2865_v63 = vld [vmem:[%s2820_s9 + $0x20] sm:$0xff]  }
  0x6a   : >> { %v442_v24 = vmul.f32 10.0, %v440_v8  ;;  %v452_v39 = vmul.f32 10.0, %v450_v9  ;;  %v462_v43 = vmul.f32 10.0, %v460_v10  ;;  %v2021_v11 = vunpack.c.l.bf16 %v2848_v13 }
  0x6b   : >> { %v472_v45 = vmul.f32 10.0, %v470_v17  ;;  %v482_v46 = vmul.f32 10.0, %v480_v19  ;;  %v424_v7 = vadd.f32 1.0, %v2447_v41  ;;  %v2025_v14 = vunpack.c.l.bf16 %v2851_v23  ;;  %v2882_v41 = vld [vmem:[%s2820_s9 + $0x30] sm:$0xff]  }
  0x6c   : >> { %v445_v8 = vmul.f32 1.442695, %v442_v24  ;;  %v455_v9 = vmul.f32 1.442695, %v452_v39  ;;  %v2874_v10 = vmul.f32 0.5, %v364_v16  ;;  %v2876_v17 = vmul.f32 0.5, %v384_v15 }
  0x6d   : >> { %v465_v19 = vmul.f32 1.442695, %v462_v43  ;;  %v475_v2 = vmul.f32 1.442695, %v472_v45  ;;  %v2878_v0 = vmul.f32 0.5, %v404_v54  ;;  %v2029_v52 = vunpack.c.l.bf16 %v2855_v62  ;;  %v2885_v24 = vld [vmem:[%s2820_s9 + $0x170] sm:$0xff]  }
  0x6e   : >> { %2458 = vpow2.f32 %v445_v8  ;;  %v485_v57 = vmul.f32 1.442695, %v482_v46  ;;  %3475 = vst [vmem:[#allocation25_spill] sm:$0xff] %v2885_v24  ;;  %v2887_v39 = vmul.f32 0.5, %v424_v7  ;;  %v2033_v16 = vunpack.c.l.bf16 %v2858_v40 }
  0x6f   : >> { %2460 = vpow2.f32 %v455_v9  ;;  %v2037_v15 = vunpack.c.l.bf16 %v2862_v51  ;;  %v2041_v54 = vunpack.c.l.bf16 %v2865_v63  ;;  %v2045_v45 = vunpack.c.l.bf16 %v2868_v1 }
  0x70   : >> { %2462 = vpow2.f32 %v465_v19  ;;  %v2049_v46 = vunpack.c.l.bf16 %v2872_v3  ;;  %v2053_v7 = vunpack.c.l.bf16 %v2882_v41  ;;  %v2057_v9 = vunpack.c.l.bf16 %v2885_v24 }
  0x71   : >> { %2464 = vpow2.f32 %v475_v2  ;;  %v2061_v19 = vunpack.c.l.bf16 %v2892_v47  ;;  %v2022_v24 = vunpack.c.h.bf16 %v2848_v13 }
  0x72   : >> { %v2449_v43 = vpop.eup %2448  ;;  %2466 = vpow2.f32 %v485_v57 }
  0x73   : >> { %v2451_v8 = vpop.eup %2450  ;;  %v447_v44 = vmul.f32 %v2449_v43, %v2816_v50 }
  0x74   : >> { %v2453_v34 = vpop.eup %2452  ;;  %v457_v6 = vmul.f32 %v2451_v8, %v2826_v55 }
  0x75   : >> { %v2455_v12 = vpop.eup %2454  ;;  %v467_v59 = vmul.f32 %v2453_v34, %v2828_v56  ;;  %v2906_v4 = vmul.f32 %v1969_v28, %v447_v44  ;;  %v2910_v50 = vmul.f32 %v1973_v29, %v447_v44  ;;  %v2914_v2 = vmul.f32 %v1977_v30, %v447_v44 }
  0x76   : >> { %v2457_v55 = vpop.eup %2456  ;;  %v477_v57 = vmul.f32 %v2455_v12, %v2834_v60  ;;  %v2919_v43 = vmul.f32 %v1981_v35, %v457_v6  ;;  %v2923_v34 = vmul.f32 %v1985_v36, %v457_v6  ;;  %v2928_v29 = vmul.f32 %v1989_v37, %v457_v6 }
  0x77   : >> { %3477 = vst [vmem:[#allocation27_spill] sm:$0xff] %v2914_v2  ;;  %v487_v56 = vmax.f32 %v2457_v55, 1e-10  ;;  %v2932_v30 = vmul.f32 %v1993_v42, %v467_v59  ;;  %v2936_v60 = vmul.f32 %v1997_v48, %v467_v59  ;;  %v2940_v35 = vmul.f32 %v2001_v49, %v467_v59 }
  0x78   : >> { %3478 = vst [vmem:[#allocation28_spill] sm:$0xff] %v2919_v43  ;;  %v2944_v36 = vmul.f32 %v2005_v61, %v477_v57  ;;  %v3479_v12 = vunpack.c.l.bf16 %v2824_v53  ;;  %v3480_v42 = vunpack.c.l.bf16 %v2841_v5  ;;  %v3481_v48 = vunpack.c.l.bf16 %v2832_v58 }
  0x79   : >> { %v489_v55 = vadd.f32 %v487_v56, %v447_v44  ;;  %v632_v49 = vmul.f32 %v2021_v11, %v2910_v50  ;;  %v643_v33 = vmul.f32 %v2025_v14, %v2914_v2  ;;  %v653_v61 = vmul.f32 %v2029_v52, %v2919_v43 }
  0x7a   : >> { %v2948_v37 = vmul.f32 %v3479_v12, %v477_v57  ;;  %v623_v8 = vmul.f32 %v3480_v42, %v2906_v4  ;;  %v2955_v28 = vmul.f32 %v3481_v48, %v477_v57  ;;  %v664_v47 = vmul.f32 %v2033_v16, %v2923_v34 }
  0x7b   : >> { %v2018_v12 = vunpack.c.h.bf16 %v2841_v5  ;;  %v491_v53 = vadd.f32 %v489_v55, %v457_v6  ;;  %v675_v44 = vmul.f32 %v2037_v15, %v2928_v29  ;;  %v685_v42 = vmul.f32 %v2041_v54, %v2932_v30  ;;  %v2459_v5 = vpop.eup %2458 }
  0x7c   : >> { %v634_v38 = vadd.f32 %v632_v49, %v623_v8  ;;  %v696_v48 = vmul.f32 %v2045_v45, %v2936_v60  ;;  %v2967_v11 = vmul.f32 %v2049_v46, %v2940_v35  ;;  %v2970_v14 = vmul.f32 %v2053_v7, %v2944_v36  ;;  %v2461_v54 = vpop.eup %2460 }
  0x7d   : >> { %v2973_v52 = vmul.f32 %v2057_v9, %v2948_v37  ;;  %v493_v16 = vadd.f32 %v491_v53, %v467_v59  ;;  %v2976_v6 = vmul.f32 %v2061_v19, %v2955_v28  ;;  %v2026_v15 = vunpack.c.h.bf16 %v2851_v23  ;;  %v2463_v55 = vpop.eup %2462 }
  0x7e   : >> { %v645_v13 = vadd.f32 %v643_v33, %v634_v38  ;;  %v448_v45 = vmul.f32 %v2459_v5, %v2874_v10  ;;  %v2030_v46 = vunpack.c.h.bf16 %v2855_v62  ;;  %v2034_v8 = vunpack.c.h.bf16 %v2858_v40  ;;  %v2465_v38 = vpop.eup %2464 }
  0x7f   : >> { %v2038_v7 = vunpack.c.h.bf16 %v2862_v51  ;;  %v495_v9 = vadd.f32 %v493_v16, %v477_v57  ;;  %v458_v49 = vmul.f32 %v2461_v54, %v2876_v17  ;;  %v2042_v33 = vunpack.c.h.bf16 %v2865_v63  ;;  %v2992_v19 = vpop.eup %2466 }
  0x80   : >> { %v655_v53 = vadd.f32 %v653_v61, %v645_v13  ;;  %v3482_v59 = vunpack.c.h.bf16 %v2751_v18  ;;  %v2046_v10 = vunpack.c.h.bf16 %v2868_v1  ;;  %v2050_v62 = vunpack.c.h.bf16 %v2872_v3 }
  0x81   : >> { %v2054_v40 = vunpack.c.h.bf16 %v2882_v41  ;;  %2468 = vrcp.f32 %v495_v9  ;;  %v468_v51 = vmul.f32 %v2463_v55, %v2878_v0  ;;  %v3483_v17 = vunpack.c.h.bf16 %v2754_v20 }
  0x82   : >> { %v2987_v23 = vmul.f32 %v3482_v59, %v448_v45  ;;  %v3484_v63 = vunpack.c.h.bf16 %v2757_v21  ;;  %v3003_v61 = vsub.f32 %v495_v9, %v487_v56  ;;  %v478_v1 = vmul.f32 %v2465_v38, %v2887_v39  ;;  %v3491_v38 = vld [vmem:[#allocation23_spill] sm:$0xff] }
  0x83   : >> { %v2997_v57 = vmul.f32 %v3483_v17, %v448_v45  ;;  %v3462_v3 = vmax.f32 %v2992_v19, 1e-10  ;;  %v3485_v41 = vunpack.c.h.bf16 %v2760_v22  ;;  %v3486_v0 = vunpack.c.h.bf16 %v2765_v25 }
  0x84   : >> { %v3001_v18 = vmul.f32 %v3484_v63, %v448_v45  ;;  %v3487_v20 = vunpack.c.h.bf16 %v2768_v26  ;;  %v3488_v56 = vunpack.c.h.bf16 %v2771_v27  ;;  %v666_v39 = vadd.f32 %v664_v47, %v655_v53 }
  0x85   : >> { %v3009_v5 = vmul.f32 %v3485_v41, %v458_v49  ;;  %v3013_v16 = vmul.f32 %v3486_v0, %v458_v49  ;;  %v490_v22 = vadd.f32 %v3462_v3, %v448_v45  ;;  %v3489_v54 = vunpack.c.h.bf16 %v2777_v31  ;;  %v3494_v31 = vld [vmem:[#allocation24_spill] sm:$0xff]  ;;  %v3114_v3 = vld [vmem:[%s2820_s9 + $0x70] sm:$0xff]  }
  0x86   : >> { %v3017_v21 = vmul.f32 %v3487_v20, %v458_v49  ;;  %v3021_v13 = vmul.f32 %v3488_v56, %v468_v51  ;;  %v3490_v25 = vunpack.c.h.bf16 %v2780_v32  ;;  %v624_v26 = vmul.f32 %v2018_v12, %v2987_v23  ;;  %v3050_v20 = vld [vmem:[%s2820_s9 + $0x40] sm:$0xff]  }
  0x87   : >> { %v3027_v55 = vmul.f32 %v3489_v54, %v468_v51  ;;  %v3492_v27 = vunpack.c.h.bf16 %v3491_v38  ;;  %v677_v17 = vadd.f32 %v675_v44, %v666_v39  ;;  %v633_v47 = vmul.f32 %v2022_v24, %v2997_v57  ;;  %v3053_v56 = vld [vmem:[%s2820_s9 + $0x180] sm:$0xff]   ;;  %v3066_v38 = vld [vmem:[%s2820_s9 + $0x50] sm:$0xff]  }
  0x88   : >> { %v3031_v9 = vmul.f32 %v3490_v25, %v468_v51  ;;  %v644_v45 = vmul.f32 %v2026_v15, %v3001_v18  ;;  %v492_v53 = vadd.f32 %v490_v22, %v458_v49  ;;  %v3495_v63 = vunpack.c.h.bf16 %v3494_v31  ;;  %v3058_v39 = vld [vmem:[%s2820_s9 + $0x2c0] sm:$0xff]   ;;  %v3498_v31 = vld [vmem:[#allocation26_spill] sm:$0xff] }
  0x89   : >> { %v3036_v59 = vmul.f32 %v3492_v27, %v478_v1  ;;  %v3496_v32 = vunpack.c.h.bf16 %v2832_v58  ;;  %v654_v12 = vmul.f32 %v2030_v46, %v3009_v5  ;;  %v687_v44 = vadd.f32 %v685_v42, %v677_v17  ;;  %v3074_v17 = vld [vmem:[%s2820_s9 + $0x190] sm:$0xff]  }
  0x8a   : >> { %v3042_v41 = vmul.f32 %v3495_v63, %v478_v1  ;;  %v635_v24 = vadd.f32 %v633_v47, %v624_v26  ;;  %v665_v15 = vmul.f32 %v2034_v8, %v3013_v16  ;;  %v676_v49 = vmul.f32 %v2038_v7, %v3017_v21 }
  0x8b   : >> { %3493 = vst [vmem:[#allocation23_spill] sm:$0xff] %v3036_v59  ;;  %v3046_v0 = vmul.f32 %v3496_v32, %v478_v1  ;;  %v494_v22 = vadd.f32 %v492_v53, %v468_v51  ;;  %v686_v58 = vmul.f32 %v2042_v33, %v3021_v13  ;;  %v697_v54 = vmul.f32 %v2046_v10, %v3027_v55  ;;  %v3497_v33 = vld [vmem:[#allocation25_spill] sm:$0xff] }
  0x8c   : >> { %v708_v46 = vmul.f32 %v2050_v62, %v3031_v9  ;;  %v698_v25 = vadd.f32 %v696_v48, %v687_v44  ;;  %v646_v42 = vadd.f32 %v644_v45, %v635_v24  ;;  %v2065_v26 = vunpack.c.l.bf16 %v3050_v20  ;;  %v3080_v53 = vld [vmem:[%s2820_s9 + $0x2d0] sm:$0xff]  }
  0x8d   : >> { %v2069_v8 = vunpack.c.l.bf16 %v3053_v56  ;;  %v496_v7 = vadd.f32 %v494_v22, %v478_v1  ;;  %v3069_v51 = vmul.f32 %v2054_v40, %v3036_v59  ;;  %v2058_v27 = vunpack.c.h.bf16 %v3497_v33  ;;  %v3083_v1 = vld [vmem:[%s2820_s9 + $0x60] sm:$0xff]  }
  0x8e   : >> { %v2073_v10 = vunpack.c.l.bf16 %v3058_v39  ;;  %v709_v48 = vadd.f32 %v2967_v11, %v698_v25  ;;  %v656_v62 = vadd.f32 %v654_v12, %v646_v42  ;;  %v754_v47 = vmul.f32 %v2065_v26, %v2906_v4  ;;  %v3086_v40 = vld [vmem:[%s2820_s9 + $0x1a0] sm:$0xff]   ;;  %v3093_v25 = vpop.eup %2468 }
  0x8f   : >> { %v763_v45 = vmul.f32 %v2069_v8, %v2910_v50  ;;  %2470 = vrcp.f32 %v496_v7  ;;  %v2062_v63 = vunpack.c.h.bf16 %v3498_v31  ;;  %v2077_v11 = vunpack.c.l.bf16 %v3066_v38 }
  0x90   : >> { %v774_v32 = vmul.f32 %v2073_v10, %v2914_v2  ;;  %v719_v12 = vadd.f32 %v2970_v14, %v709_v48  ;;  %v667_v44 = vadd.f32 %v665_v15, %v656_v62  ;;  %v2081_v22 = vunpack.c.l.bf16 %v3074_v17  ;;  %v3104_v14 = vld [vmem:[%s2820_s9 + $0x2e0] sm:$0xff]  }
  0x91   : >> { %v765_v24 = vadd.f32 %v763_v45, %v754_v47  ;;  %v784_v42 = vmul.f32 %v2077_v11, %v2919_v43  ;;  %v2085_v26 = vunpack.c.l.bf16 %v3080_v53  ;;  %v2089_v8 = vunpack.c.l.bf16 %v3083_v1 }
  0x92   : >> { %v2093_v33 = vunpack.c.l.bf16 %v3086_v40  ;;  %v503_v15 = vmul.f32 %v3093_v25, %v3003_v61  ;;  %v730_v10 = vadd.f32 %v2973_v52, %v719_v12  ;;  %v678_v48 = vadd.f32 %v676_v49, %v667_v44  ;;  %v3120_v61 = vld [vmem:[%s2820_s9 + $0x1b0] sm:$0xff]  }
  0x93   : >> { %v776_v62 = vadd.f32 %v774_v32, %v765_v24  ;;  %v729_v47 = vmul.f32 %v2058_v27, %v3042_v41  ;;  %v740_v45 = vmul.f32 %v2062_v63, %v3046_v0  ;;  %v795_v31 = vmul.f32 %v2081_v22, %v2923_v34  ;;  %v3123_v49 = vld [vmem:[%s2820_s9 + $0x2f0] sm:$0xff]  }
  0x94   : >> { %v806_v11 = vmul.f32 %v2085_v26, %v2928_v29  ;;  %1733 = vst [vmem:[%s3097_s7 + $0xa0] sm:$0xff] %v503_v15  ;;  %v741_v43 = vadd.f32 %v2976_v6, %v730_v10  ;;  %v688_v59 = vadd.f32 %v686_v58, %v678_v48  ;;  %v2097_v52 = vunpack.c.l.bf16 %v3104_v14 }
  0x95   : >> { %v786_v2 = vadd.f32 %v784_v42, %v776_v62  ;;  %v3499_v27 = vmax.f32 %v2992_v19, 1e-10  ;;  %v816_v32 = vmul.f32 %v2089_v8, %v2932_v30  ;;  %v827_v12 = vmul.f32 %v2093_v33, %v2936_v60 }
  0x96   : >> { %v2066_v44 = vunpack.c.h.bf16 %v3050_v20  ;;  %v743_v6 = vmul.f32 %v3093_v25, %v741_v43  ;;  %v699_v58 = vadd.f32 %v697_v54, %v688_v59  ;;  %v2101_v22 = vunpack.c.l.bf16 %v3114_v3 }
  0x97   : >> { %v502_v63 = vsub.f32 %v496_v7, %v3499_v27  ;;  %v797_v24 = vadd.f32 %v795_v31, %v786_v2  ;;  %v838_v42 = vmul.f32 %v2097_v52, %v2940_v35  ;;  %v2105_v26 = vunpack.c.l.bf16 %v3120_v61 }
  0x98   : >> { %v2109_v15 = vunpack.c.l.bf16 %v3123_v49  ;;  %v755_v19 = vmul.f32 %v2066_v44, %v2987_v23  ;;  %746 = vst [vmem:[%s3097_s7] sm:$0xff] %v743_v6  ;;  %v710_v7 = vadd.f32 %v708_v46, %v699_v58  ;;  %v2070_v33 = vunpack.c.h.bf16 %v3053_v56  ;;  %v3157_v44 = vld [vmem:[%s2820_s9 + $0x80] sm:$0xff]  }
  0x99   : >> { %v808_v8 = vadd.f32 %v806_v11, %v797_v24  ;;  %v2074_v20 = vunpack.c.h.bf16 %v3058_v39  ;;  %v2078_v43 = vunpack.c.h.bf16 %v3066_v38  ;;  %v2082_v2 = vunpack.c.h.bf16 %v3074_v17  ;;  %v3161_v24 = vld [vmem:[%s2820_s9 + $0x1c0] sm:$0xff]  }
  0x9a   : >> { %v2086_v59 = vunpack.c.h.bf16 %v3080_v53  ;;  %v2090_v54 = vunpack.c.h.bf16 %v3083_v1  ;;  %v720_v10 = vadd.f32 %v3069_v51, %v710_v7  ;;  %v764_v62 = vmul.f32 %v2070_v33, %v2997_v57 }
  0x9b   : >> { %v818_v48 = vadd.f32 %v816_v32, %v808_v8  ;;  %v775_v46 = vmul.f32 %v2074_v20, %v3001_v18  ;;  %v848_v56 = vmul.f32 %v2101_v22, %v2944_v36  ;;  %v859_v39 = vmul.f32 %v2105_v26, %v2948_v37  ;;  %v3180_v20 = vld [vmem:[%s2820_s9 + $0x310] sm:$0xff]  }
  0x9c   : >> { %v785_v38 = vmul.f32 %v2078_v43, %v3009_v5  ;;  %v3149_v17 = vpop.eup %2470  ;;  %v731_v53 = vadd.f32 %v729_v47, %v720_v10  ;;  %v766_v1 = vadd.f32 %v764_v62, %v755_v19  ;;  %v2094_v31 = vunpack.c.h.bf16 %v3086_v40  ;;  %v3164_v40 = vld [vmem:[%s2820_s9 + $0x300] sm:$0xff]  }
  0x9d   : >> { %v829_v51 = vadd.f32 %v827_v12, %v818_v48  ;;  %v504_v11 = vmul.f32 %v3149_v17, %v502_v63  ;;  %v870_v52 = vmul.f32 %v2109_v15, %v2955_v28  ;;  %v796_v27 = vmul.f32 %v2082_v2, %v3013_v16  ;;  %v3167_v63 = vld [vmem:[%s2820_s9 + $0x90] sm:$0xff]   ;;  %v3193_v62 = vld [vmem:[%s2820_s9 + $0x1e0] sm:$0xff]  }
  0x9e   : >> { %v807_v32 = vmul.f32 %v2086_v59, %v3017_v21  ;;  %v742_v6 = vadd.f32 %v740_v45, %v731_v53  ;;  %v777_v47 = vadd.f32 %v775_v46, %v766_v1  ;;  %v817_v12 = vmul.f32 %v2090_v54, %v3021_v13  ;;  %v3175_v15 = vld [vmem:[%s2820_s9 + $0x1d0] sm:$0xff]  }
  0x9f   : >> { %v840_v58 = vadd.f32 %v838_v42, %v829_v51  ;;  %1734 = vst [vmem:[%s3097_s7 + $0xa8] sm:$0xff] %v504_v11  ;;  %v828_v22 = vmul.f32 %v2094_v31, %v3027_v55  ;;  %v2098_v26 = vunpack.c.h.bf16 %v3104_v14  ;;  %v2102_v45 = vunpack.c.h.bf16 %v3114_v3 }
  0xa0   : >> { %v2106_v42 = vunpack.c.h.bf16 %v3120_v61  ;;  %v744_v19 = vmul.f32 %v3149_v17, %v742_v6  ;;  %v787_v8 = vadd.f32 %v785_v38, %v777_v47  ;;  %v2113_v33 = vunpack.c.l.bf16 %v3157_v44  ;;  %v3187_v61 = vld [vmem:[%s2820_s9 + $0xa0] sm:$0xff]   ;;  %v3502_v47 = vld [vmem:[#allocation28_spill] sm:$0xff] }
  0xa1   : >> { %v850_v7 = vadd.f32 %v848_v56, %v840_v58  ;;  %v2110_v43 = vunpack.c.h.bf16 %v3123_v49  ;;  %v2117_v2 = vunpack.c.l.bf16 %v3161_v24  ;;  %v2121_v14 = vunpack.c.l.bf16 %v3164_v40  ;;  %v3500_v56 = vld [vmem:[#allocation27_spill] sm:$0xff] }
  0xa2   : >> { %v2125_v3 = vunpack.c.l.bf16 %v3167_v63  ;;  %747 = vst [vmem:[%s3097_s7 + $0x8] sm:$0xff] %v744_v19  ;;  %v798_v54 = vadd.f32 %v796_v27, %v787_v8  ;;  %v885_v10 = vmul.f32 %v2113_v33, %v2906_v4  ;;  %v2129_v48 = vunpack.c.l.bf16 %v3175_v15  ;;  %v3202_v27 = vld [vmem:[%s2820_s9 + $0x320] sm:$0xff]   ;;  %v3214_v33 = vld [vmem:[%s2820_s9 + $0x1f0] sm:$0xff]  }
  0xa3   : >> { %v861_v59 = vadd.f32 %v859_v39, %v850_v7  ;;  %v839_v49 = vmul.f32 %v2098_v26, %v3031_v9  ;;  %v894_v46 = vmul.f32 %v2117_v2, %v2910_v50  ;;  %v905_v38 = vmul.f32 %v2121_v14, %v3500_v56  ;;  %v3501_v39 = vld [vmem:[#allocation23_spill] sm:$0xff]  ;;  %v3208_v7 = vld [vmem:[%s2820_s9 + $0xb0] sm:$0xff]  }
  0xa4   : >> { %v2133_v53 = vunpack.c.l.bf16 %v3180_v20  ;;  %v809_v1 = vadd.f32 %v807_v32, %v798_v54  ;;  %v849_v31 = vmul.f32 %v2102_v45, %v3501_v39  ;;  %v2137_v11 = vunpack.c.l.bf16 %v3187_v61 }
  0xa5   : >> { %v872_v51 = vadd.f32 %v870_v52, %v861_v59  ;;  %v860_v6 = vmul.f32 %v2106_v42, %v3042_v41  ;;  %v896_v58 = vadd.f32 %v894_v46, %v885_v10  ;;  %v915_v26 = vmul.f32 %v2125_v3, %v3502_v47  ;;  %v3220_v59 = vld [vmem:[%s2820_s9 + $0x330] sm:$0xff]  }
  0xa6   : >> { %v2141_v19 = vunpack.c.l.bf16 %v3193_v62  ;;  %v819_v32 = vadd.f32 %v817_v12, %v809_v1  ;;  %v871_v45 = vmul.f32 %v2110_v43, %v3046_v0  ;;  %v926_v8 = vmul.f32 %v2129_v48, %v2923_v34 }
  0xa7   : >> { %v874_v52 = vmul.f32 %v3093_v25, %v872_v51  ;;  %v907_v2 = vadd.f32 %v905_v38, %v896_v58  ;;  %v937_v14 = vmul.f32 %v2133_v53, %v2928_v29  ;;  %v947_v42 = vmul.f32 %v2137_v11, %v2932_v30 }
  0xa8   : >> { %v2145_v3 = vunpack.c.l.bf16 %v3202_v27  ;;  %v830_v54 = vadd.f32 %v828_v22, %v819_v32  ;;  %v958_v10 = vmul.f32 %v2141_v19, %v2936_v60  ;;  %v2149_v12 = vunpack.c.l.bf16 %v3208_v7 }
  0xa9   : >> { %1840 = vst [vmem:[%s3097_s7 + $0x20] sm:$0xff] %v874_v52  ;;  %v2114_v43 = vunpack.c.h.bf16 %v3157_v44  ;;  %v917_v48 = vadd.f32 %v915_v26, %v907_v2  ;;  %v2153_v46 = vunpack.c.l.bf16 %v3214_v33  ;;  %v2118_v38 = vunpack.c.h.bf16 %v3161_v24 }
  0xaa   : >> { %v2122_v53 = vunpack.c.h.bf16 %v3164_v40  ;;  %v841_v51 = vadd.f32 %v839_v49, %v830_v54  ;;  %v2157_v1 = vunpack.c.l.bf16 %v3220_v59  ;;  %v2126_v22 = vunpack.c.h.bf16 %v3167_v63 }
  0xab   : >> { %v886_v11 = vmul.f32 %v2114_v43, %v2987_v23  ;;  %v928_v58 = vadd.f32 %v926_v8, %v917_v48  ;;  %v895_v19 = vmul.f32 %v2118_v38, %v2997_v57  ;;  %v2130_v26 = vunpack.c.h.bf16 %v3175_v15  ;;  %v3249_v38 = vld [vmem:[%s2820_s9 + $0x200] sm:$0xff]  }
  0xac   : >> { %v906_v44 = vmul.f32 %v2122_v53, %v3001_v18  ;;  %v851_v52 = vadd.f32 %v849_v31, %v841_v51  ;;  %v969_v24 = vmul.f32 %v2145_v3, %v2940_v35  ;;  %v2134_v40 = vunpack.c.h.bf16 %v3180_v20  ;;  %v3244_v3 = vld [vmem:[%s2820_s9 + $0xc0] sm:$0xff]  }
  0xad   : >> { %v2138_v49 = vunpack.c.h.bf16 %v3187_v61  ;;  %v939_v32 = vadd.f32 %v937_v14, %v928_v58  ;;  %v897_v2 = vadd.f32 %v895_v19, %v886_v11  ;;  %v916_v63 = vmul.f32 %v2126_v22, %v3009_v5  ;;  %v3255_v53 = vld [vmem:[%s2820_s9 + $0x340] sm:$0xff]   ;;  %v3260_v22 = vld [vmem:[%s2820_s9 + $0xd0] sm:$0xff]  }
  0xae   : >> { %v2142_v8 = vunpack.c.h.bf16 %v3193_v62  ;;  %v862_v54 = vadd.f32 %v860_v6, %v851_v52  ;;  %v979_v43 = vmul.f32 %v2149_v12, %v2944_v36  ;;  %v990_v15 = vmul.f32 %v2153_v46, %v2948_v37  ;;  %v3263_v58 = vld [vmem:[%s2820_s9 + $0x210] sm:$0xff]  }
  0xaf   : >> { %v1001_v31 = vmul.f32 %v2157_v1, %v2955_v28  ;;  %v949_v20 = vadd.f32 %v947_v42, %v939_v32  ;;  %v908_v61 = vadd.f32 %v906_v44, %v897_v2  ;;  %v927_v14 = vmul.f32 %v2130_v26, %v3013_v16  ;;  %v3273_v26 = vld [vmem:[%s2820_s9 + $0xe0] sm:$0xff]  }
  0xb0   : >> { %v938_v48 = vmul.f32 %v2134_v40, %v3017_v21  ;;  %v873_v62 = vadd.f32 %v871_v45, %v862_v54  ;;  %v948_v6 = vmul.f32 %v2138_v49, %v3021_v13  ;;  %v959_v12 = vmul.f32 %v2142_v8, %v3027_v55  ;;  %v3266_v45 = vld [vmem:[%s2820_s9 + $0x350] sm:$0xff]  }
  0xb1   : >> { %v2146_v46 = vunpack.c.h.bf16 %v3202_v27  ;;  %v960_v51 = vadd.f32 %v958_v10, %v949_v20  ;;  %v918_v42 = vadd.f32 %v916_v63, %v908_v61  ;;  %v2150_v1 = vunpack.c.h.bf16 %v3208_v7  ;;  %v3283_v63 = vld [vmem:[%s2820_s9 + $0x220] sm:$0xff]  }
  0xb2   : >> { %v2161_v11 = vunpack.c.l.bf16 %v3244_v3  ;;  %v875_v19 = vmul.f32 %v3149_v17, %v873_v62  ;;  %v2154_v27 = vunpack.c.h.bf16 %v3214_v33  ;;  %v2158_v44 = vunpack.c.h.bf16 %v3220_v59 }
  0xb3   : >> { %v2165_v10 = vunpack.c.l.bf16 %v3249_v38  ;;  %v971_v7 = vadd.f32 %v969_v24, %v960_v51  ;;  %v929_v52 = vadd.f32 %v927_v14, %v918_v42  ;;  %v2169_v49 = vunpack.c.l.bf16 %v3255_v53 }
  0xb4   : >> { %v1017_v40 = vmul.f32 %v2161_v11, %v2906_v4  ;;  %1841 = vst [vmem:[%s3097_s7 + $0x28] sm:$0xff] %v875_v19  ;;  %v2173_v2 = vunpack.c.l.bf16 %v3260_v22  ;;  %v2177_v33 = vunpack.c.l.bf16 %v3263_v58  ;;  %v2181_v59 = vunpack.c.l.bf16 %v3266_v45 }
  0xb5   : >> { %v1026_v32 = vmul.f32 %v2165_v10, %v2910_v50  ;;  %v981_v24 = vadd.f32 %v979_v43, %v971_v7  ;;  %v940_v8 = vadd.f32 %v938_v48, %v929_v52  ;;  %v1037_v54 = vmul.f32 %v2169_v49, %v3500_v56  ;;  %v3292_v10 = vld [vmem:[%s2820_s9 + $0x360] sm:$0xff]   ;;  %v3295_v43 = vld [vmem:[%s2820_s9 + $0xf0] sm:$0xff]  }
  0xb6   : >> { %v2185_v20 = vunpack.c.l.bf16 %v3273_v26  ;;  %v970_v61 = vmul.f32 %v2146_v46, %v3031_v9  ;;  %v1048_v62 = vmul.f32 %v2173_v2, %v3502_v47  ;;  %v980_v11 = vmul.f32 %v2150_v1, %v3501_v39  ;;  %v3298_v48 = vld [vmem:[%s2820_s9 + $0x230] sm:$0xff]  }
  0xb7   : >> { %v1028_v14 = vadd.f32 %v1026_v32, %v1017_v40  ;;  %v992_v51 = vadd.f32 %v990_v15, %v981_v24  ;;  %v950_v42 = vadd.f32 %v948_v6, %v940_v8  ;;  %v2189_v19 = vunpack.c.l.bf16 %v3283_v63 }
  0xb8   : >> { %v991_v7 = vmul.f32 %v2154_v27, %v3042_v41  ;;  %v1002_v46 = vmul.f32 %v2158_v44, %v3046_v0  ;;  %v1059_v40 = vmul.f32 %v2177_v33, %v2923_v34  ;;  %v1070_v1 = vmul.f32 %v2181_v59, %v2928_v29  ;;  %v3309_v27 = vld [vmem:[%s2820_s9 + $0x370] sm:$0xff]  }
  0xb9   : >> { %v1039_v52 = vadd.f32 %v1037_v54, %v1028_v14  ;;  %v1003_v15 = vadd.f32 %v1001_v31, %v992_v51  ;;  %v961_v6 = vadd.f32 %v959_v12, %v950_v42  ;;  %v1081_v49 = vmul.f32 %v2185_v20, %v2932_v30 }
  0xba   : >> { %v2193_v2 = vunpack.c.l.bf16 %v3292_v10  ;;  %v2197_v24 = vunpack.c.l.bf16 %v3295_v43  ;;  %v2201_v8 = vunpack.c.l.bf16 %v3298_v48  ;;  %v1092_v31 = vmul.f32 %v2189_v19, %v2936_v60 }
  0xbb   : >> { %v1050_v32 = vadd.f32 %v1048_v62, %v1039_v52  ;;  %v1005_v44 = vmul.f32 %v3093_v25, %v1003_v15  ;;  %v972_v54 = vadd.f32 %v970_v61, %v961_v6  ;;  %v2162_v12 = vunpack.c.h.bf16 %v3244_v3 }
  0xbc   : >> { %v2166_v59 = vunpack.c.h.bf16 %v3249_v38  ;;  %v2170_v20 = vunpack.c.h.bf16 %v3255_v53  ;;  %v2174_v14 = vunpack.c.h.bf16 %v3260_v22  ;;  %v2205_v51 = vunpack.c.l.bf16 %v3309_v27 }
  0xbd   : >> { %v1061_v33 = vadd.f32 %v1059_v40, %v1050_v32  ;;  %1879 = vst [vmem:[%s3097_s7 + $0x40] sm:$0xff] %v1005_v44  ;;  %v982_v62 = vadd.f32 %v980_v11, %v972_v54  ;;  %v1018_v42 = vmul.f32 %v2162_v12, %v2987_v23  ;;  %v2178_v52 = vunpack.c.h.bf16 %v3263_v58  ;;  %v2315_v12 = vld [vmem:[%s2820_s9 + $0x380] sm:$0xff]  }
  0xbe   : >> { %v1027_v3 = vmul.f32 %v2166_v59, %v2997_v57  ;;  %v1038_v19 = vmul.f32 %v2170_v20, %v3001_v18  ;;  %v2182_v38 = vunpack.c.h.bf16 %v3266_v45  ;;  %v1103_v22 = vmul.f32 %v2193_v2, %v2940_v35  ;;  %v3335_v2 = vld [vmem:[%s2820_s9 + $0x240] sm:$0xff]  }
  0xbf   : >> { %v1072_v61 = vadd.f32 %v1070_v1, %v1061_v33  ;;  %v993_v53 = vadd.f32 %v991_v7, %v982_v62  ;;  %v2186_v11 = vunpack.c.h.bf16 %v3273_v26  ;;  %v1114_v58 = vmul.f32 %v2197_v24, %v2944_v36  ;;  %v3332_v7 = vld [vmem:[%s2820_s9 + $0x100] sm:$0xff]  }
  0xc0   : >> { %v1029_v15 = vadd.f32 %v1027_v3, %v1018_v42  ;;  %v1049_v6 = vmul.f32 %v2174_v14, %v3009_v5  ;;  %v1125_v32 = vmul.f32 %v2201_v8, %v2948_v37  ;;  %v1136_v44 = vmul.f32 %v2205_v51, %v2955_v28  ;;  %v3344_v8 = vld [vmem:[%s2820_s9 + $0x250] sm:$0xff]  }
  0xc1   : >> { %v1083_v40 = vadd.f32 %v1081_v49, %v1072_v61  ;;  %v1004_v1 = vadd.f32 %v1002_v46, %v993_v53  ;;  %v1060_v45 = vmul.f32 %v2178_v52, %v3013_v16  ;;  %v1071_v24 = vmul.f32 %v2182_v38, %v3017_v21  ;;  %v3341_v46 = vld [vmem:[%s2820_s9 + $0x110] sm:$0xff]  }
  0xc2   : >> { %v1040_v49 = vadd.f32 %v1038_v19, %v1029_v15  ;;  %v2190_v54 = vunpack.c.h.bf16 %v3283_v63  ;;  %v1082_v59 = vmul.f32 %v2186_v11, %v3021_v13  ;;  %v2194_v20 = vunpack.c.h.bf16 %v3292_v10  ;;  %v3353_v42 = vld [vmem:[%s2820_s9 + $0x390] sm:$0xff]   ;;  %v3366_v15 = vld [vmem:[%s2820_s9 + $0x120] sm:$0xff]  }
  0xc3   : >> { %v1094_v26 = vadd.f32 %v1092_v31, %v1083_v40  ;;  %v1006_v33 = vmul.f32 %v3149_v17, %v1004_v1  ;;  %v2198_v14 = vunpack.c.h.bf16 %v3295_v43  ;;  %v2209_v51 = vunpack.c.l.bf16 %v3332_v7 }
  0xc4   : >> { %v1051_v62 = vadd.f32 %v1049_v6, %v1040_v49  ;;  %v2213_v63 = vunpack.c.l.bf16 %v3335_v2  ;;  %v2202_v52 = vunpack.c.h.bf16 %v3298_v48  ;;  %v2217_v61 = vunpack.c.l.bf16 %v2315_v12 }
  0xc5   : >> { %v1105_v31 = vadd.f32 %v1103_v22, %v1094_v26  ;;  %1880 = vst [vmem:[%s3097_s7 + $0x48] sm:$0xff] %v1006_v33  ;;  %v2221_v3 = vunpack.c.l.bf16 %v3341_v46  ;;  %v2225_v19 = vunpack.c.l.bf16 %v3344_v8  ;;  %v1152_v38 = vmul.f32 %v2209_v51, %v2906_v4  ;;  %v2321_v33 = vld [vmem:[%s2820_s9 + $0x3a0] sm:$0xff]   ;;  %v2322_v51 = vld [vmem:[%s2820_s9 + $0x130] sm:$0xff]  }
  0xc6   : >> { %v1062_v43 = vadd.f32 %v1060_v45, %v1051_v62  ;;  %v1161_v53 = vmul.f32 %v2213_v63, %v2910_v50  ;;  %v1093_v22 = vmul.f32 %v2190_v54, %v3027_v55  ;;  %v2206_v11 = vunpack.c.h.bf16 %v3309_v27  ;;  %v2320_v45 = vld [vmem:[%s2820_s9 + $0x260] sm:$0xff]  }
  0xc7   : >> { %v1116_v10 = vadd.f32 %v1114_v58, %v1105_v31  ;;  %v1172_v40 = vmul.f32 %v2217_v61, %v3500_v56  ;;  %v2229_v48 = vunpack.c.l.bf16 %v3353_v42  ;;  %v1183_v58 = vmul.f32 %v2221_v3, %v3502_v47 }
  0xc8   : >> { %v1073_v1 = vadd.f32 %v1071_v24, %v1062_v43  ;;  %v1163_v26 = vadd.f32 %v1161_v53, %v1152_v38  ;;  %v1104_v4 = vmul.f32 %v2194_v20, %v3031_v9  ;;  %v1194_v50 = vmul.f32 %v2225_v19, %v2923_v34 }
  0xc9   : >> { %v1127_v6 = vadd.f32 %v1125_v32, %v1116_v10  ;;  %v2233_v56 = vunpack.c.l.bf16 %v3366_v15  ;;  %v1115_v31 = vmul.f32 %v2198_v14, %v3501_v39  ;;  %v1126_v32 = vmul.f32 %v2202_v52, %v3042_v41  ;;  %v2323_v10 = vld [vmem:[%s2820_s9 + $0x270] sm:$0xff]  }
  0xca   : >> { %v1084_v54 = vadd.f32 %v1082_v59, %v1073_v1  ;;  %v1174_v27 = vadd.f32 %v1172_v40, %v1163_v26  ;;  %v1137_v24 = vmul.f32 %v2206_v11, %v3046_v0  ;;  %v1205_v47 = vmul.f32 %v2229_v48, %v2928_v29  ;;  %v2324_v40 = vld [vmem:[%s2820_s9 + $0x3b0] sm:$0xff]  }
  0xcb   : >> { %v1138_v49 = vadd.f32 %v1136_v44, %v1127_v6  ;;  %v2237_v44 = vunpack.c.l.bf16 %v2320_v45  ;;  %v2241_v59 = vunpack.c.l.bf16 %v2321_v33  ;;  %v2210_v63 = vunpack.c.h.bf16 %v3332_v7 }
  0xcc   : >> { %v1095_v20 = vadd.f32 %v1093_v22, %v1084_v54  ;;  %v1185_v62 = vadd.f32 %v1183_v58, %v1174_v27  ;;  %v2214_v61 = vunpack.c.h.bf16 %v3335_v2  ;;  %v2218_v14 = vunpack.c.h.bf16 %v2315_v12 }
  0xcd   : >> { %v1140_v34 = vmul.f32 %v3093_v25, %v1138_v49  ;;  %v1216_v19 = vmul.f32 %v2233_v56, %v2932_v30  ;;  %v2222_v29 = vunpack.c.h.bf16 %v3341_v46  ;;  %v1153_v43 = vmul.f32 %v2210_v63, %v2987_v23 }
  0xce   : >> { %v1106_v52 = vadd.f32 %v1104_v4, %v1095_v20  ;;  %v1196_v3 = vadd.f32 %v1194_v50, %v1185_v62  ;;  %v1162_v38 = vmul.f32 %v2214_v61, %v2997_v57  ;;  %v1173_v53 = vmul.f32 %v2218_v14, %v3001_v18 }
  0xcf   : >> { %1918 = vst [vmem:[%s3097_s7 + $0x60] sm:$0xff] %v1140_v34  ;;  %v2226_v7 = vunpack.c.h.bf16 %v3344_v8  ;;  %v1227_v12 = vmul.f32 %v2237_v44, %v2936_v60  ;;  %v2245_v11 = vunpack.c.l.bf16 %v2322_v51  ;;  %v1184_v30 = vmul.f32 %v2222_v29, %v3009_v5 }
  0xd0   : >> { %v1117_v22 = vadd.f32 %v1115_v31, %v1106_v52  ;;  %v1207_v2 = vadd.f32 %v1205_v47, %v1196_v3  ;;  %v1164_v48 = vadd.f32 %v1162_v38, %v1153_v43  ;;  %v2230_v46 = vunpack.c.h.bf16 %v3353_v42 }
  0xd1   : >> { %v1238_v23 = vmul.f32 %v2241_v59, %v2940_v35  ;;  %v2249_v57 = vunpack.c.l.bf16 %v2323_v10  ;;  %v1195_v18 = vmul.f32 %v2226_v7, %v3013_v16  ;;  %v2234_v8 = vunpack.c.h.bf16 %v3366_v15 }
  0xd2   : >> { %v1128_v6 = vadd.f32 %v1126_v32, %v1117_v22  ;;  %v1218_v1 = vadd.f32 %v1216_v19, %v1207_v2  ;;  %v1175_v26 = vadd.f32 %v1173_v53, %v1164_v48  ;;  %v1249_v4 = vmul.f32 %v2245_v11, %v2944_v36 }
  0xd3   : >> { %v2253_v50 = vunpack.c.l.bf16 %v2324_v40  ;;  %v1206_v5 = vmul.f32 %v2230_v46, %v3017_v21  ;;  %v2238_v42 = vunpack.c.h.bf16 %v2320_v45  ;;  %v1260_v35 = vmul.f32 %v2249_v57, %v2948_v37 }
  0xd4   : >> { %v1139_v58 = vadd.f32 %v1137_v24, %v1128_v6  ;;  %v1229_v60 = vadd.f32 %v1227_v12, %v1218_v1  ;;  %v1186_v49 = vadd.f32 %v1184_v30, %v1175_v26  ;;  %v1217_v31 = vmul.f32 %v2234_v8, %v3021_v13 }
  0xd5   : >> { %v2242_v16 = vunpack.c.h.bf16 %v2321_v33  ;;  %v1271_v32 = vmul.f32 %v2253_v50, %v2955_v28  ;;  %v1228_v24 = vmul.f32 %v2238_v42, %v3027_v55  ;;  %v2246_v47 = vunpack.c.h.bf16 %v2322_v51 }
  0xd6   : >> { %v1141_v54 = vmul.f32 %v3149_v17, %v1139_v58  ;;  %v1240_v27 = vadd.f32 %v1238_v23, %v1229_v60  ;;  %v1197_v56 = vadd.f32 %v1195_v18, %v1186_v49  ;;  %v2250_v20 = vunpack.c.h.bf16 %v2323_v10 }
  0xd7   : >> { %v1239_v34 = vmul.f32 %v2242_v16, %v3031_v9  ;;  %v1250_v13 = vmul.f32 %v2246_v47, %v3501_v39  ;;  %v2254_v33 = vunpack.c.h.bf16 %v2324_v40 }
  0xd8   : >> { %1919 = vst [vmem:[%s3097_s7 + $0x68] sm:$0xff] %v1141_v54  ;;  %v1251_v15 = vadd.f32 %v1249_v4, %v1240_v27  ;;  %v1208_v36 = vadd.f32 %v1206_v5, %v1197_v56  ;;  %v1261_v28 = vmul.f32 %v2250_v20, %v3042_v41 }
  0xd9   : >> { %v1272_v55 = vmul.f32 %v2254_v33, %v3046_v0 }
  0xda   : >> { %v1262_v21 = vadd.f32 %v1260_v35, %v1251_v15  ;;  %v1219_v45 = vadd.f32 %v1217_v31, %v1208_v36 }
  0xdc   : >> { %v1273_v37 = vadd.f32 %v1271_v32, %v1262_v21  ;;  %v1230_v62 = vadd.f32 %v1228_v24, %v1219_v45 }
  0xde   : >> { %v1275_v44 = vmul.f32 %v3093_v25, %v1273_v37  ;;  %v1241_v59 = vadd.f32 %v1239_v34, %v1230_v62 }
  0xe0   : >> { %1957 = vst [vmem:[%s3097_s7 + $0x80] sm:$0xff] %v1275_v44  ;;  %v1252_v63 = vadd.f32 %v1250_v13, %v1241_v59 }
  0xe2   : >> { %v1263_v51 = vadd.f32 %v1261_v28, %v1252_v63 }
  0xe4   : >> { %v1274_v61 = vadd.f32 %v1272_v55, %v1263_v51  ;;  %349 = sbr.rel (!%p347_p1) target bundleno = 77 (0x4d), region = 214 }
  0xe6   : >> { %v1276_v14 = vmul.f32 %v3149_v17, %v1274_v61 }
  0xe8   : >> { %1958 = vst [vmem:[%s3097_s7 + $0x88] sm:$0xff] %v1276_v14 }
  0xe9   : > { %s1966_s22 = sshll.u32 %s2588_s16, 9  ;;  %s1304_s8 = sshll.u32 %s2717_s11, 4  ;;  %s1305_s8 = int_to_ptr.vmem [resolvable:$true] %s1304_s8 }
  0xea   : > { %s1293_s26 = scalar_lea.hbm %s3457_s3, %s1966_s22  ;;  %s2540_s17 = smov 512  }
  0xeb   : > { %2356 = sst [smem:[#allocation16]] (%p2615_p9), %s2540_s17  ;;  %s2541_s10 = smov 1024  }
  0xec   : > { %2357 = sst [smem:[#allocation16 + $0x1]] (%p2615_p9), %s2541_s10  ;;  %s2542_s20 = smov 4  }
  0xed   : > { %2358 = sst [smem:[#allocation16 + $0x2]] (%p2615_p9), %s2542_s20  ;;  %s2543_s27 = smov 128  }
  0xee   : > { %2359 = sst [smem:[#allocation16 + $0x3]] (%p2615_p9), %s2543_s27  ;;  %s2544_s16 = smov 8  }
  0xef   : > { %2360 = sst [smem:[#allocation16 + $0x4]] (%p2615_p9), %s2543_s27  ;;  %s2545_s28 = smov 131072  }
  0xf0   : > { %2361 = sst [smem:[#allocation16 + $0x5]] (%p2615_p9), %s2544_s16  ;;  %s2546_s11 = smov 0  }
  0xf1   : > { %2362 = dma.general (%p2615_p9), %s1305_s8, 3072, %s1293_s26, %s1281_s19, %s2545_s28, [#allocation16], %s2546_s11, 0  }
  0xf2 PF: > { %s1332_s23 = sand.u32 1, %s2506_s12   ;;  %p2365_p2 = pnand %p1694_p11, %p2619_p10 }
  0xf3   : > { %s1333_s29 = scalar_lea.sflag [#allocation4], %s1332_s23 }
  0xf4   : > { %p2366_p3 = pneg %p2365_p2 }
  0xf6   : > { %2501 = dma.done.wait (%p2366_p3), %s1333_s29, 3072  }
  0xf7   : > { %2503 = vsyncadd (%p2366_p3), %s1333_s29, 4294964224  ;;  %p19_p4 = scmp.ge.s32.totalorder %s2592_s18, 4   ;;  %s3503_s12 = smov %s2510_s13 }
  0xf8   : > { %s3504_s13 = smov %s2514_s14  ;;  %s3505_s14 = smov %s2604_s21 }
  0xf9   : > { %s3506_s15 = smov %s2592_s18  ;;  %21 = sbr.rel (!%p19_p4) target bundleno = 7 (0x7), region = 225 }
  0xfe   :  { %1338 = vsyncpa [#allocation3], 1 }
  0xff   :  { %1340 = vsyncpa [#allocation3 + $0x1], 1 }
 0x100   :  { %1341 = vsyncpa [#allocation6], 1 }
 0x101   :  { %1343 = vsyncpa [#allocation6 + $0x1], 1 }
 0x102   :  { %1344 = vsyncpa [#allocation4], 1 }
 0x103   :  { %1346 = vsyncpa [#allocation4 + $0x1], 1 }

</bundles_post_ra>
